<compile_context>
chip_gen: v7x
topology: tpu7x:2x2x1
jax: 0.10.0
libtpu: 0.0.40
codegen_flags: <defaults>
</compile_context>

<pallas_src>
import math

import jax
import jax.numpy as jnp
from jax.experimental import pallas as pl
from jax.experimental.pallas import tpu as pltpu


def _layernorm(h, g, b, eps=1e-5):
    mu = jnp.mean(h, axis=-1, keepdims=True)
    var = jnp.mean((h - mu) ** 2, axis=-1, keepdims=True)
    return (h - mu) * jax.lax.rsqrt(var + eps) * g + b


# Row indices of the packed (8, H) small-vector operand.
_BO, _G1, _B1, _BF1, _BF2, _G2, _B2, _WP = range(8)


def _choose_block_b(batch, length, target_m=256):
    """Pick a batch block so the fused matmul M = TB*L is MXU-sized, but keep
    >= 2 grid steps when possible so both v7x TensorCores get work."""
    tb = max(1, min(batch, target_m // max(length, 1)))
    while batch % tb:
        tb -= 1
    if batch // tb < 2 and batch >= 2:
        tb = max(1, batch // 2)
        while batch % tb:
            tb -= 1
    return tb


def _vmem_limit_bytes(tb, length, hidden, n_head, d_head):
    act = 2 * tb * length * hidden * 4                      # x, y f32 blocks
    small_io = 2 * tb * length * 4                          # mask + output blocks
    wmat = (3 * n_head * hidden * d_head                    # bf16 weight slabs
            + n_head * d_head * hidden + 2 * hidden * hidden) * 2
    packed = (8 * hidden + 3 * n_head * d_head) * 4
    inter = 24 * tb * length * hidden * 4                   # f32 intermediates headroom
    est = 2 * (act + small_io) + 2 * wmat + packed + inter  # 2x = double buffering
    return int(min(48 << 20, max(16 << 20, 2 * est)))


def make_encoder_kernel(n_head, length, hidden, block_b):
    d_head = hidden // n_head
    tbl = block_b * length  # fused matmul M dimension

    def kernel(x_ref, y_ref, m_ref,
               wq_ref, wk_ref, wv_ref, wo_ref, wf1_ref, wf2_ref,
               qkvb_ref, vec_ref, bp_ref, out_ref):
        # Activations: (TB, L, H) f32; fold batch into the matmul M dimension.
        x = x_ref[...].reshape(tbl, hidden)
        y = y_ref[...].reshape(tbl, hidden)
        xb = x.astype(jnp.bfloat16)          # bf16 operands for the MXU,
        yb = y.astype(jnp.bfloat16)          # accumulation stays f32.

        vec = vec_ref[...]                   # (8, H) packed biases/gains/wp
        qkvb = qkvb_ref[...]                 # (3*nh, dh) per-head q/k/v biases

        # Causal + key-padding mask: built once per step, shared by all heads.
        # Precondition: every query row has >= 1 valid key (driver forces
        # x_co[:, 0] = 1); a fully-masked row would silently degrade to a
        # uniform softmax over the masked scores.
        row = jax.lax.broadcasted_iota(jnp.int32, (length, length), 0)
        col = jax.lax.broadcasted_iota(jnp.int32, (length, length), 1)
        causal = (col <= row)[None]                        # (1, L, L)
        kmask = m_ref[...] > 0.5                           # (TB, 1, L)
        valid = jnp.logical_and(causal, kmask)             # (TB, L, L)

        # Multi-head attention with per-head contiguous weight slabs; the
        # output projection is accumulated per head (no concat, no lane slices).
        attn = jnp.zeros((tbl, hidden), jnp.float32)
        for h in range(n_head):
            qh = jnp.dot(xb, wq_ref[h], preferred_element_type=jnp.float32)
            kh = jnp.dot(yb, wk_ref[h], preferred_element_type=jnp.float32)
            vh = jnp.dot(yb, wv_ref[h], preferred_element_type=jnp.float32)
            qh = qh + qkvb[h:h + 1]                        # 1/sqrt(dh) pre-folded
            kh = kh + qkvb[n_head + h:n_head + h + 1]
            vh = vh + qkvb[2 * n_head + h:2 * n_head + h + 1]

            q3 = qh.reshape(block_b, length, d_head).astype(jnp.bfloat16)
            k3 = kh.reshape(block_b, length, d_head).astype(jnp.bfloat16)
            v3 = vh.reshape(block_b, length, d_head).astype(jnp.bfloat16)

            s = jnp.einsum("bqd,bkd->bqk", q3, k3,
                           preferred_element_type=jnp.float32)
            s = jnp.where(valid, s, -1e30)                 # scores/mask kept f32
            s = s - jnp.max(s, axis=-1, keepdims=True)
            p = jnp.exp(s)
            p = p * pl.reciprocal(jnp.sum(p, axis=-1, keepdims=True), approx=True)

            ctx = jnp.einsum("bqk,bkd->bqd", p.astype(jnp.bfloat16), v3,
                             preferred_element_type=jnp.float32)
            attn = attn + jnp.dot(
                ctx.reshape(tbl, d_head).astype(jnp.bfloat16), wo_ref[h],
                preferred_element_type=jnp.float32)
        attn = attn + vec[_BO:_BO + 1]

        # Residual + LN, FFN (ReLU), residual + LN — elementwise math in f32.
        h1 = _layernorm(x + attn, vec[_G1:_G1 + 1], vec[_B1:_B1 + 1])
        ff = jnp.dot(h1.astype(jnp.bfloat16), wf1_ref[...],
                     preferred_element_type=jnp.float32) + vec[_BF1:_BF1 + 1]
        ff = jnp.maximum(ff, 0.0)
        ff = jnp.dot(ff.astype(jnp.bfloat16), wf2_ref[...],
                     preferred_element_type=jnp.float32) + vec[_BF2:_BF2 + 1]
        h2 = _layernorm(h1 + ff, vec[_G2:_G2 + 1], vec[_B2:_B2 + 1])

        # Prediction head as a VPU multiply + cross-lane reduce; lane-dense
        # (TB, 1, L) output block instead of a width-1 masked store.
        logit = jnp.sum(h2.reshape(block_b, length, hidden) * vec[_WP:_WP + 1],
                        axis=-1) + bp_ref[0]
        out_ref[...] = jax.nn.sigmoid(logit).reshape(block_b, 1, length)

    return kernel


def init_params(key, head, length, hidden, n_question):
    ks = jax.random.split(key, 12)

    def w(k, shape, scale=0.05):
        return (scale * jax.random.normal(k, shape)).astype(jnp.float32)

    return {
        "n_head": head,
        "n_question": n_question,
        # embedding tables
        "interaction_emb": w(ks[0], (2 * n_question, hidden)),
        "exercise_emb": w(ks[1], (n_question, hidden)),
        "pos_emb": w(ks[2], (length, hidden)),
        # attention projections
        "wq": w(ks[3], (hidden, hidden)), "bq": jnp.zeros((1, hidden), jnp.float32),
        "wk": w(ks[4], (hidden, hidden)), "bk": jnp.zeros((1, hidden), jnp.float32),
        "wv": w(ks[5], (hidden, hidden)), "bv": jnp.zeros((1, hidden), jnp.float32),
        "wo": w(ks[6], (hidden, hidden)), "bo": jnp.zeros((1, hidden), jnp.float32),
        # layernorms
        "ln1_g": jnp.ones((1, hidden), jnp.float32), "ln1_b": jnp.zeros((1, hidden), jnp.float32),
        "ln2_g": jnp.ones((1, hidden), jnp.float32), "ln2_b": jnp.zeros((1, hidden), jnp.float32),
        # feed-forward
        "w_ff1": w(ks[7], (hidden, hidden)), "b_ff1": jnp.zeros((1, hidden), jnp.float32),
        "w_ff2": w(ks[8], (hidden, hidden)), "b_ff2": jnp.zeros((1, hidden), jnp.float32),
        # prediction head
        "wp": w(ks[9], (hidden, 1)), "bp": jnp.zeros((1, 1), jnp.float32),
    }


def sakt_forward(params, y_ids, x_co, QorS="Question"):
    B, L = y_ids.shape
    H = params["exercise_emb"].shape[1]
    nq = params["n_question"]
    nh = params["n_head"]
    assert H % nh == 0
    dh = H // nh
    scale = 1.0 / math.sqrt(dh)

    # --- Embedding (glue: gathers in plain JAX) ---
    ex_ids = y_ids % nq
    x = params["exercise_emb"][ex_ids] + params["pos_emb"][None]          # (B, L, H)
    y_emb = params["interaction_emb"][y_ids] + params["pos_emb"][None]    # (B, L, H)
    mask = x_co.astype(jnp.float32).reshape(B, 1, L)                      # (B, 1, L)

    # --- Pre-split per-head weights into contiguous slabs (wrapper-side),
    #     fold the 1/sqrt(dh) score scale into Wq/bq, cast MXU operands to bf16.
    def split_cols(wmat):                      # (H, H) -> (nh, H, dh)
        return jnp.transpose(wmat.reshape(H, nh, dh), (1, 0, 2))

    wq_h = (split_cols(params["wq"]) * scale).astype(jnp.bfloat16)
    wk_h = split_cols(params["wk"]).astype(jnp.bfloat16)
    wv_h = split_cols(params["wv"]).astype(jnp.bfloat16)
    wo_h = params["wo"].reshape(nh, dh, H).astype(jnp.bfloat16)
    wf1 = params["w_ff1"].astype(jnp.bfloat16)
    wf2 = params["w_ff2"].astype(jnp.bfloat16)

    qkv_bias = jnp.concatenate([
        params["bq"].reshape(nh, dh) * scale,
        params["bk"].reshape(nh, dh),
        params["bv"].reshape(nh, dh),
    ], axis=0).astype(jnp.float32)                                        # (3*nh, dh)

    vec = jnp.concatenate([
        params["bo"], params["ln1_g"], params["ln1_b"],
        params["b_ff1"], params["b_ff2"], params["ln2_g"], params["ln2_b"],
        params["wp"].T,
    ], axis=0).astype(jnp.float32)                                        # (8, H)
    bp = params["bp"].reshape(1).astype(jnp.float32)                      # SMEM scalar

    TB = _choose_block_b(B, L)
    kernel = make_encoder_kernel(nh, L, H, TB)

    def full(arr):
        nd = arr.ndim
        return pl.BlockSpec(arr.shape, lambda b, nd=nd: (0,) * nd)

    in_specs = [
        pl.BlockSpec((TB, L, H), lambda b: (b, 0, 0)),      # x (queries)
        pl.BlockSpec((TB, L, H), lambda b: (b, 0, 0)),      # y (keys/values)
        pl.BlockSpec((TB, 1, L), lambda b: (b, 0, 0)),      # key-validity mask
        full(wq_h), full(wk_h), full(wv_h), full(wo_h), full(wf1), full(wf2),
        full(qkv_bias), full(vec),
        pl.BlockSpec(memory_space=pltpu.MemorySpace.SMEM),  # bp scalar
    ]

    out = pl.pallas_call(
        kernel,
        out_shape=jax.ShapeDtypeStruct((B, 1, L), jnp.float32),
        grid=(B // TB,),
        in_specs=in_specs,
        out_specs=pl.BlockSpec((TB, 1, L), lambda b: (b, 0, 0)),
        compiler_params=pltpu.CompilerParams(
            dimension_semantics=("parallel",),
            vmem_limit_bytes=_vmem_limit_bytes(TB, L, H, nh, dh),
        ),
    )(x, y_emb, mask, wq_h, wk_h, wv_h, wo_h, wf1, wf2, qkv_bias, vec, bp)

    return out.reshape(B, L, 1)  # (B, L, 1) probabilities


if __name__ == "__main__":
    # small SAKT config: head=4, length=8, hidden=32, n_question=10, dropout=0.2 (eval)
    head, length, hidden, n_question = 4, 8, 32, 10
    batch = 2

    root = jax.random.PRNGKey(0)
    k_par, k_y, k_m = jax.random.split(root, 3)

    params = init_params(k_par, head, length, hidden, n_question)

    # interaction ids in [0, 2*n_question)
    y_ids = jax.random.randint(k_y, (batch, length), 0, 2 * n_question, dtype=jnp.int32)
    # x_co: key-validity mask (first position forced valid -> every query row
    # attends to at least one valid key, satisfying the kernel precondition)
    x_co = jax.random.bernoulli(k_m, 0.8, (batch, length)).astype(jnp.int32)
    x_co = x_co.at[:, 0].set(1)

    probs = sakt_forward(params, y_ids, x_co, QorS="Question")
    probs = jax.block_until_ready(probs)

    assert probs.shape == (batch, length, 1)
    assert bool(jnp.all(jnp.isfinite(probs)))
    assert bool(jnp.all((probs >= 0.0) & (probs <= 1.0)))
    print("KERNEL_OK")
</pallas_src>

<mosaic_0001>
module attributes {stable_mosaic.version = 11 : i64} {
  func.func @kernel(%arg0: i32, %arg1: memref<1x8x32xf32, #tpu.memory_space<vmem>>, %arg2: memref<1x8x32xf32, #tpu.memory_space<vmem>>, %arg3: memref<1x1x8xf32, #tpu.memory_space<vmem>>, %arg4: memref<4x32x8xbf16, #tpu.memory_space<vmem>>, %arg5: memref<4x32x8xbf16, #tpu.memory_space<vmem>>, %arg6: memref<4x32x8xbf16, #tpu.memory_space<vmem>>, %arg7: memref<4x8x32xbf16, #tpu.memory_space<vmem>>, %arg8: memref<32x32xbf16, #tpu.memory_space<vmem>>, %arg9: memref<32x32xbf16, #tpu.memory_space<vmem>>, %arg10: memref<12x8xf32, #tpu.memory_space<vmem>>, %arg11: memref<8x32xf32, #tpu.memory_space<vmem>>, %arg12: memref<1xf32, #tpu.memory_space<smem>>, %arg13: memref<1x1x8xf32, #tpu.memory_space<vmem>>) attributes {dimension_semantics = [#tpu.dimension_semantics<parallel>], iteration_bounds = array<i64: 2>, scalar_prefetch = 0 : i64, scratch_operands = 0 : i64, tpu.core_type = #tpu.core_type<tc>, window_params = [{transform_indices = @transform_0, window_bounds = array<i64: 1, 8, 32>}, {transform_indices = @transform_1, window_bounds = array<i64: 1, 8, 32>}, {transform_indices = @transform_2, window_bounds = array<i64: 1, 1, 8>}, {pipeline_mode = #tpu.pipeline_mode<synchronous>, transform_indices = @transform_3, window_bounds = array<i64: 4, 32, 8>}, {pipeline_mode = #tpu.pipeline_mode<synchronous>, transform_indices = @transform_4, window_bounds = array<i64: 4, 32, 8>}, {pipeline_mode = #tpu.pipeline_mode<synchronous>, transform_indices = @transform_5, window_bounds = array<i64: 4, 32, 8>}, {pipeline_mode = #tpu.pipeline_mode<synchronous>, transform_indices = @transform_6, window_bounds = array<i64: 4, 8, 32>}, {pipeline_mode = #tpu.pipeline_mode<synchronous>, transform_indices = @transform_7, window_bounds = array<i64: 32, 32>}, {pipeline_mode = #tpu.pipeline_mode<synchronous>, transform_indices = @transform_8, window_bounds = array<i64: 32, 32>}, {pipeline_mode = #tpu.pipeline_mode<synchronous>, transform_indices = @transform_9, window_bounds = array<i64: 12, 8>}, {pipeline_mode = #tpu.pipeline_mode<synchronous>, transform_indices = @transform_10, window_bounds = array<i64: 8, 32>}, {transform_indices = @transform_11, window_bounds = array<i64: 1>}, {transform_indices = @transform_12, window_bounds = array<i64: 1, 1, 8>}]} {
    %c0 = arith.constant 0 : index
    %c0_0 = arith.constant 0 : index
    %c0_1 = arith.constant 0 : index
    %0 = vector.load %arg1[%c0, %c0_0, %c0_1] : memref<1x8x32xf32, #tpu.memory_space<vmem>>, vector<1x8x32xf32>
    %1 = vector.shape_cast %0 : vector<1x8x32xf32> to vector<8x32xf32>
    %c0_2 = arith.constant 0 : index
    %c0_3 = arith.constant 0 : index
    %c0_4 = arith.constant 0 : index
    %2 = vector.load %arg2[%c0_2, %c0_3, %c0_4] : memref<1x8x32xf32, #tpu.memory_space<vmem>>, vector<1x8x32xf32>
    %3 = vector.shape_cast %2 : vector<1x8x32xf32> to vector<8x32xf32>
    %4 = arith.truncf %1 : vector<8x32xf32> to vector<8x32xbf16>
    %5 = arith.truncf %3 : vector<8x32xf32> to vector<8x32xbf16>
    %c0_5 = arith.constant 0 : index
    %c0_6 = arith.constant 0 : index
    %6 = vector.load %arg11[%c0_5, %c0_6] : memref<8x32xf32, #tpu.memory_space<vmem>>, vector<8x32xf32>
    %c0_7 = arith.constant 0 : index
    %c0_8 = arith.constant 0 : index
    %7 = vector.load %arg10[%c0_7, %c0_8] : memref<12x8xf32, #tpu.memory_space<vmem>>, vector<12x8xf32>
    %8 = tpu.iota {dimensions = array<i32: 0>} : vector<8x8xi32>
    %9 = tpu.iota {dimensions = array<i32: 1>} : vector<8x8xi32>
    %10 = arith.cmpi sle, %9, %8 : vector<8x8xi32>
    %11 = vector.shape_cast %10 : vector<8x8xi1> to vector<1x8x8xi1>
    %c0_9 = arith.constant 0 : index
    %c0_10 = arith.constant 0 : index
    %c0_11 = arith.constant 0 : index
    %12 = vector.load %arg3[%c0_9, %c0_10, %c0_11] : memref<1x1x8xf32, #tpu.memory_space<vmem>>, vector<1x1x8xf32>
    %cst = arith.constant 5.000000e-01 : f32
    %13 = vector.broadcast %cst : f32 to vector<1x1x8xf32>
    %14 = arith.cmpf ogt, %12, %13 : vector<1x1x8xf32>
    %15 = vector.broadcast %14 : vector<1x1x8xi1> to vector<1x8x8xi1>
    %16 = arith.andi %11, %15 : vector<1x8x8xi1>
    %cst_12 = arith.constant 0.000000e+00 : f32
    %17 = vector.broadcast %cst_12 : f32 to vector<8x32xf32>
    %c0_13 = arith.constant 0 : index
    %c0_14 = arith.constant 0 : index
    %c0_15 = arith.constant 0 : index
    %18 = vector.load %arg4[%c0_13, %c0_14, %c0_15] : memref<4x32x8xbf16, #tpu.memory_space<vmem>>, vector<1x32x8xbf16>
    %19 = vector.shape_cast %18 : vector<1x32x8xbf16> to vector<32x8xbf16>
    %cst_16 = arith.constant dense<0.000000e+00> : vector<8x8xf32>
    %20 = tpu.matmul %4, %19, %cst_16 {dimension_numbers = #tpu.dot_dimension_numbers<[1], [0], [0], [1], [0, 0, 1, 1], [], []>} : vector<8x32xbf16>, vector<32x8xbf16>, vector<8x8xf32> -> vector<8x8xf32>
    %c0_17 = arith.constant 0 : index
    %c0_18 = arith.constant 0 : index
    %c0_19 = arith.constant 0 : index
    %21 = vector.load %arg5[%c0_17, %c0_18, %c0_19] : memref<4x32x8xbf16, #tpu.memory_space<vmem>>, vector<1x32x8xbf16>
    %22 = vector.shape_cast %21 : vector<1x32x8xbf16> to vector<32x8xbf16>
    %cst_20 = arith.constant dense<0.000000e+00> : vector<8x8xf32>
    %23 = tpu.matmul %5, %22, %cst_20 {dimension_numbers = #tpu.dot_dimension_numbers<[1], [0], [0], [1], [0, 0, 1, 1], [], []>} : vector<8x32xbf16>, vector<32x8xbf16>, vector<8x8xf32> -> vector<8x8xf32>
    %c0_21 = arith.constant 0 : index
    %c0_22 = arith.constant 0 : index
    %c0_23 = arith.constant 0 : index
    %24 = vector.load %arg6[%c0_21, %c0_22, %c0_23] : memref<4x32x8xbf16, #tpu.memory_space<vmem>>, vector<1x32x8xbf16>
    %25 = vector.shape_cast %24 : vector<1x32x8xbf16> to vector<32x8xbf16>
    %cst_24 = arith.constant dense<0.000000e+00> : vector<8x8xf32>
    %26 = tpu.matmul %5, %25, %cst_24 {dimension_numbers = #tpu.dot_dimension_numbers<[1], [0], [0], [1], [0, 0, 1, 1], [], []>} : vector<8x32xbf16>, vector<32x8xbf16>, vector<8x8xf32> -> vector<8x8xf32>
    %27 = vector.extract_strided_slice %7 {offsets = [0, 0], sizes = [1, 8], strides = [1, 1]} : vector<12x8xf32> to vector<1x8xf32>
    %28 = vector.broadcast %27 : vector<1x8xf32> to vector<8x8xf32>
    %29 = arith.addf %20, %28 : vector<8x8xf32>
    %30 = vector.extract_strided_slice %7 {offsets = [4, 0], sizes = [1, 8], strides = [1, 1]} : vector<12x8xf32> to vector<1x8xf32>
    %31 = vector.broadcast %30 : vector<1x8xf32> to vector<8x8xf32>
    %32 = arith.addf %23, %31 : vector<8x8xf32>
    %33 = vector.extract_strided_slice %7 {offsets = [8, 0], sizes = [1, 8], strides = [1, 1]} : vector<12x8xf32> to vector<1x8xf32>
    %34 = vector.broadcast %33 : vector<1x8xf32> to vector<8x8xf32>
    %35 = arith.addf %26, %34 : vector<8x8xf32>
    %36 = vector.shape_cast %29 : vector<8x8xf32> to vector<1x8x8xf32>
    %37 = arith.truncf %36 : vector<1x8x8xf32> to vector<1x8x8xbf16>
    %38 = vector.shape_cast %32 : vector<8x8xf32> to vector<1x8x8xf32>
    %39 = arith.truncf %38 : vector<1x8x8xf32> to vector<1x8x8xbf16>
    %40 = vector.shape_cast %35 : vector<8x8xf32> to vector<1x8x8xf32>
    %41 = arith.truncf %40 : vector<1x8x8xf32> to vector<1x8x8xbf16>
    "tpu.trace_start"() <{level = 10 : i32, message = "bqd,bkd->bqk"}> : () -> ()
    %cst_25 = arith.constant dense<0.000000e+00> : vector<1x8x8xf32>
    %42 = tpu.matmul %37, %39, %cst_25 {dimension_numbers = #tpu.dot_dimension_numbers<[2], [2], [1], [1], [0, 0, 0, 1, 1, 1], [0], [0]>} : vector<1x8x8xbf16>, vector<1x8x8xbf16>, vector<1x8x8xf32> -> vector<1x8x8xf32>
    %cst_26 = arith.constant -1.000000e+30 : f32
    "tpu.trace_stop"() : () -> ()
    %43 = vector.broadcast %cst_26 : f32 to vector<1x8x8xf32>
    %44 = arith.select %16, %42, %43 : vector<1x8x8xi1>, vector<1x8x8xf32>
    %cst_27 = arith.constant dense<0xFF800000> : vector<1x8xf32>
    %45 = vector.multi_reduction <maximumf>, %44, %cst_27 [2] : vector<1x8x8xf32> to vector<1x8xf32>
    %46 = vector.shape_cast %45 : vector<1x8xf32> to vector<1x8x1xf32>
    %47 = vector.broadcast %46 : vector<1x8x1xf32> to vector<1x8x8xf32>
    %48 = arith.subf %44, %47 : vector<1x8x8xf32>
    %49 = math.exp %48 : vector<1x8x8xf32>
    %cst_28 = arith.constant dense<0.000000e+00> : vector<1x8xf32>
    %50 = vector.multi_reduction <add>, %49, %cst_28 [2] : vector<1x8x8xf32> to vector<1x8xf32>
    %51 = vector.shape_cast %50 : vector<1x8xf32> to vector<1x8x1xf32>
    %52 = tpu.reciprocal %51 {approx = true} : vector<1x8x1xf32> -> vector<1x8x1xf32>
    %53 = vector.broadcast %52 : vector<1x8x1xf32> to vector<1x8x8xf32>
    %54 = arith.mulf %49, %53 : vector<1x8x8xf32>
    %55 = arith.truncf %54 : vector<1x8x8xf32> to vector<1x8x8xbf16>
    "tpu.trace_start"() <{level = 10 : i32, message = "bqk,bkd->bqd"}> : () -> ()
    %cst_29 = arith.constant dense<0.000000e+00> : vector<1x8x8xf32>
    %56 = tpu.matmul %55, %41, %cst_29 {dimension_numbers = #tpu.dot_dimension_numbers<[2], [1], [1], [2], [0, 0, 0, 1, 1, 2], [0], [0]>} : vector<1x8x8xbf16>, vector<1x8x8xbf16>, vector<1x8x8xf32> -> vector<1x8x8xf32>
    "tpu.trace_stop"() : () -> ()
    %57 = vector.shape_cast %56 : vector<1x8x8xf32> to vector<8x8xf32>
    %58 = arith.truncf %57 : vector<8x8xf32> to vector<8x8xbf16>
    %c0_30 = arith.constant 0 : index
    %c0_31 = arith.constant 0 : index
    %c0_32 = arith.constant 0 : index
    %59 = vector.load %arg7[%c0_30, %c0_31, %c0_32] : memref<4x8x32xbf16, #tpu.memory_space<vmem>>, vector<1x8x32xbf16>
    %60 = vector.shape_cast %59 : vector<1x8x32xbf16> to vector<8x32xbf16>
    %cst_33 = arith.constant dense<0.000000e+00> : vector<8x32xf32>
    %61 = tpu.matmul %58, %60, %cst_33 {dimension_numbers = #tpu.dot_dimension_numbers<[1], [0], [0], [1], [0, 0, 1, 1], [], []>} : vector<8x8xbf16>, vector<8x32xbf16>, vector<8x32xf32> -> vector<8x32xf32>
    %62 = arith.addf %17, %61 : vector<8x32xf32>
    %c1 = arith.constant 1 : index
    %c0_34 = arith.constant 0 : index
    %c0_35 = arith.constant 0 : index
    %63 = vector.load %arg4[%c1, %c0_34, %c0_35] : memref<4x32x8xbf16, #tpu.memory_space<vmem>>, vector<1x32x8xbf16>
    %64 = vector.shape_cast %63 : vector<1x32x8xbf16> to vector<32x8xbf16>
    %cst_36 = arith.constant dense<0.000000e+00> : vector<8x8xf32>
    %65 = tpu.matmul %4, %64, %cst_36 {dimension_numbers = #tpu.dot_dimension_numbers<[1], [0], [0], [1], [0, 0, 1, 1], [], []>} : vector<8x32xbf16>, vector<32x8xbf16>, vector<8x8xf32> -> vector<8x8xf32>
    %c1_37 = arith.constant 1 : index
    %c0_38 = arith.constant 0 : index
    %c0_39 = arith.constant 0 : index
    %66 = vector.load %arg5[%c1_37, %c0_38, %c0_39] : memref<4x32x8xbf16, #tpu.memory_space<vmem>>, vector<1x32x8xbf16>
    %67 = vector.shape_cast %66 : vector<1x32x8xbf16> to vector<32x8xbf16>
    %cst_40 = arith.constant dense<0.000000e+00> : vector<8x8xf32>
    %68 = tpu.matmul %5, %67, %cst_40 {dimension_numbers = #tpu.dot_dimension_numbers<[1], [0], [0], [1], [0, 0, 1, 1], [], []>} : vector<8x32xbf16>, vector<32x8xbf16>, vector<8x8xf32> -> vector<8x8xf32>
    %c1_41 = arith.constant 1 : index
    %c0_42 = arith.constant 0 : index
    %c0_43 = arith.constant 0 : index
    %69 = vector.load %arg6[%c1_41, %c0_42, %c0_43] : memref<4x32x8xbf16, #tpu.memory_space<vmem>>, vector<1x32x8xbf16>
    %70 = vector.shape_cast %69 : vector<1x32x8xbf16> to vector<32x8xbf16>
    %cst_44 = arith.constant dense<0.000000e+00> : vector<8x8xf32>
    %71 = tpu.matmul %5, %70, %cst_44 {dimension_numbers = #tpu.dot_dimension_numbers<[1], [0], [0], [1], [0, 0, 1, 1], [], []>} : vector<8x32xbf16>, vector<32x8xbf16>, vector<8x8xf32> -> vector<8x8xf32>
    %72 = vector.extract_strided_slice %7 {offsets = [1, 0], sizes = [1, 8], strides = [1, 1]} : vector<12x8xf32> to vector<1x8xf32>
    %73 = vector.broadcast %72 : vector<1x8xf32> to vector<8x8xf32>
    %74 = arith.addf %65, %73 : vector<8x8xf32>
    %75 = vector.extract_strided_slice %7 {offsets = [5, 0], sizes = [1, 8], strides = [1, 1]} : vector<12x8xf32> to vector<1x8xf32>
    %76 = vector.broadcast %75 : vector<1x8xf32> to vector<8x8xf32>
    %77 = arith.addf %68, %76 : vector<8x8xf32>
    %78 = vector.extract_strided_slice %7 {offsets = [9, 0], sizes = [1, 8], strides = [1, 1]} : vector<12x8xf32> to vector<1x8xf32>
    %79 = vector.broadcast %78 : vector<1x8xf32> to vector<8x8xf32>
    %80 = arith.addf %71, %79 : vector<8x8xf32>
    %81 = vector.shape_cast %74 : vector<8x8xf32> to vector<1x8x8xf32>
    %82 = arith.truncf %81 : vector<1x8x8xf32> to vector<1x8x8xbf16>
    %83 = vector.shape_cast %77 : vector<8x8xf32> to vector<1x8x8xf32>
    %84 = arith.truncf %83 : vector<1x8x8xf32> to vector<1x8x8xbf16>
    %85 = vector.shape_cast %80 : vector<8x8xf32> to vector<1x8x8xf32>
    %86 = arith.truncf %85 : vector<1x8x8xf32> to vector<1x8x8xbf16>
    "tpu.trace_start"() <{level = 10 : i32, message = "bqd,bkd->bqk"}> : () -> ()
    %cst_45 = arith.constant dense<0.000000e+00> : vector<1x8x8xf32>
    %87 = tpu.matmul %82, %84, %cst_45 {dimension_numbers = #tpu.dot_dimension_numbers<[2], [2], [1], [1], [0, 0, 0, 1, 1, 1], [0], [0]>} : vector<1x8x8xbf16>, vector<1x8x8xbf16>, vector<1x8x8xf32> -> vector<1x8x8xf32>
    %cst_46 = arith.constant -1.000000e+30 : f32
    "tpu.trace_stop"() : () -> ()
    %88 = vector.broadcast %cst_46 : f32 to vector<1x8x8xf32>
    %89 = arith.select %16, %87, %88 : vector<1x8x8xi1>, vector<1x8x8xf32>
    %cst_47 = arith.constant dense<0xFF800000> : vector<1x8xf32>
    %90 = vector.multi_reduction <maximumf>, %89, %cst_47 [2] : vector<1x8x8xf32> to vector<1x8xf32>
    %91 = vector.shape_cast %90 : vector<1x8xf32> to vector<1x8x1xf32>
    %92 = vector.broadcast %91 : vector<1x8x1xf32> to vector<1x8x8xf32>
    %93 = arith.subf %89, %92 : vector<1x8x8xf32>
    %94 = math.exp %93 : vector<1x8x8xf32>
    %cst_48 = arith.constant dense<0.000000e+00> : vector<1x8xf32>
    %95 = vector.multi_reduction <add>, %94, %cst_48 [2] : vector<1x8x8xf32> to vector<1x8xf32>
    %96 = vector.shape_cast %95 : vector<1x8xf32> to vector<1x8x1xf32>
    %97 = tpu.reciprocal %96 {approx = true} : vector<1x8x1xf32> -> vector<1x8x1xf32>
    %98 = vector.broadcast %97 : vector<1x8x1xf32> to vector<1x8x8xf32>
    %99 = arith.mulf %94, %98 : vector<1x8x8xf32>
    %100 = arith.truncf %99 : vector<1x8x8xf32> to vector<1x8x8xbf16>
    "tpu.trace_start"() <{level = 10 : i32, message = "bqk,bkd->bqd"}> : () -> ()
    %cst_49 = arith.constant dense<0.000000e+00> : vector<1x8x8xf32>
    %101 = tpu.matmul %100, %86, %cst_49 {dimension_numbers = #tpu.dot_dimension_numbers<[2], [1], [1], [2], [0, 0, 0, 1, 1, 2], [0], [0]>} : vector<1x8x8xbf16>, vector<1x8x8xbf16>, vector<1x8x8xf32> -> vector<1x8x8xf32>
    "tpu.trace_stop"() : () -> ()
    %102 = vector.shape_cast %101 : vector<1x8x8xf32> to vector<8x8xf32>
    %103 = arith.truncf %102 : vector<8x8xf32> to vector<8x8xbf16>
    %c1_50 = arith.constant 1 : index
    %c0_51 = arith.constant 0 : index
    %c0_52 = arith.constant 0 : index
    %104 = vector.load %arg7[%c1_50, %c0_51, %c0_52] : memref<4x8x32xbf16, #tpu.memory_space<vmem>>, vector<1x8x32xbf16>
    %105 = vector.shape_cast %104 : vector<1x8x32xbf16> to vector<8x32xbf16>
    %cst_53 = arith.constant dense<0.000000e+00> : vector<8x32xf32>
    %106 = tpu.matmul %103, %105, %cst_53 {dimension_numbers = #tpu.dot_dimension_numbers<[1], [0], [0], [1], [0, 0, 1, 1], [], []>} : vector<8x8xbf16>, vector<8x32xbf16>, vector<8x32xf32> -> vector<8x32xf32>
    %107 = arith.addf %62, %106 : vector<8x32xf32>
    %c2 = arith.constant 2 : index
    %c0_54 = arith.constant 0 : index
    %c0_55 = arith.constant 0 : index
    %108 = vector.load %arg4[%c2, %c0_54, %c0_55] : memref<4x32x8xbf16, #tpu.memory_space<vmem>>, vector<1x32x8xbf16>
    %109 = vector.shape_cast %108 : vector<1x32x8xbf16> to vector<32x8xbf16>
    %cst_56 = arith.constant dense<0.000000e+00> : vector<8x8xf32>
    %110 = tpu.matmul %4, %109, %cst_56 {dimension_numbers = #tpu.dot_dimension_numbers<[1], [0], [0], [1], [0, 0, 1, 1], [], []>} : vector<8x32xbf16>, vector<32x8xbf16>, vector<8x8xf32> -> vector<8x8xf32>
    %c2_57 = arith.constant 2 : index
    %c0_58 = arith.constant 0 : index
    %c0_59 = arith.constant 0 : index
    %111 = vector.load %arg5[%c2_57, %c0_58, %c0_59] : memref<4x32x8xbf16, #tpu.memory_space<vmem>>, vector<1x32x8xbf16>
    %112 = vector.shape_cast %111 : vector<1x32x8xbf16> to vector<32x8xbf16>
    %cst_60 = arith.constant dense<0.000000e+00> : vector<8x8xf32>
    %113 = tpu.matmul %5, %112, %cst_60 {dimension_numbers = #tpu.dot_dimension_numbers<[1], [0], [0], [1], [0, 0, 1, 1], [], []>} : vector<8x32xbf16>, vector<32x8xbf16>, vector<8x8xf32> -> vector<8x8xf32>
    %c2_61 = arith.constant 2 : index
    %c0_62 = arith.constant 0 : index
    %c0_63 = arith.constant 0 : index
    %114 = vector.load %arg6[%c2_61, %c0_62, %c0_63] : memref<4x32x8xbf16, #tpu.memory_space<vmem>>, vector<1x32x8xbf16>
    %115 = vector.shape_cast %114 : vector<1x32x8xbf16> to vector<32x8xbf16>
    %cst_64 = arith.constant dense<0.000000e+00> : vector<8x8xf32>
    %116 = tpu.matmul %5, %115, %cst_64 {dimension_numbers = #tpu.dot_dimension_numbers<[1], [0], [0], [1], [0, 0, 1, 1], [], []>} : vector<8x32xbf16>, vector<32x8xbf16>, vector<8x8xf32> -> vector<8x8xf32>
    %117 = vector.extract_strided_slice %7 {offsets = [2, 0], sizes = [1, 8], strides = [1, 1]} : vector<12x8xf32> to vector<1x8xf32>
    %118 = vector.broadcast %117 : vector<1x8xf32> to vector<8x8xf32>
    %119 = arith.addf %110, %118 : vector<8x8xf32>
    %120 = vector.extract_strided_slice %7 {offsets = [6, 0], sizes = [1, 8], strides = [1, 1]} : vector<12x8xf32> to vector<1x8xf32>
    %121 = vector.broadcast %120 : vector<1x8xf32> to vector<8x8xf32>
    %122 = arith.addf %113, %121 : vector<8x8xf32>
    %123 = vector.extract_strided_slice %7 {offsets = [10, 0], sizes = [1, 8], strides = [1, 1]} : vector<12x8xf32> to vector<1x8xf32>
    %124 = vector.broadcast %123 : vector<1x8xf32> to vector<8x8xf32>
    %125 = arith.addf %116, %124 : vector<8x8xf32>
    %126 = vector.shape_cast %119 : vector<8x8xf32> to vector<1x8x8xf32>
    %127 = arith.truncf %126 : vector<1x8x8xf32> to vector<1x8x8xbf16>
    %128 = vector.shape_cast %122 : vector<8x8xf32> to vector<1x8x8xf32>
    %129 = arith.truncf %128 : vector<1x8x8xf32> to vector<1x8x8xbf16>
    %130 = vector.shape_cast %125 : vector<8x8xf32> to vector<1x8x8xf32>
    %131 = arith.truncf %130 : vector<1x8x8xf32> to vector<1x8x8xbf16>
    "tpu.trace_start"() <{level = 10 : i32, message = "bqd,bkd->bqk"}> : () -> ()
    %cst_65 = arith.constant dense<0.000000e+00> : vector<1x8x8xf32>
    %132 = tpu.matmul %127, %129, %cst_65 {dimension_numbers = #tpu.dot_dimension_numbers<[2], [2], [1], [1], [0, 0, 0, 1, 1, 1], [0], [0]>} : vector<1x8x8xbf16>, vector<1x8x8xbf16>, vector<1x8x8xf32> -> vector<1x8x8xf32>
    %cst_66 = arith.constant -1.000000e+30 : f32
    "tpu.trace_stop"() : () -> ()
    %133 = vector.broadcast %cst_66 : f32 to vector<1x8x8xf32>
    %134 = arith.select %16, %132, %133 : vector<1x8x8xi1>, vector<1x8x8xf32>
    %cst_67 = arith.constant dense<0xFF800000> : vector<1x8xf32>
    %135 = vector.multi_reduction <maximumf>, %134, %cst_67 [2] : vector<1x8x8xf32> to vector<1x8xf32>
    %136 = vector.shape_cast %135 : vector<1x8xf32> to vector<1x8x1xf32>
    %137 = vector.broadcast %136 : vector<1x8x1xf32> to vector<1x8x8xf32>
    %138 = arith.subf %134, %137 : vector<1x8x8xf32>
    %139 = math.exp %138 : vector<1x8x8xf32>
    %cst_68 = arith.constant dense<0.000000e+00> : vector<1x8xf32>
    %140 = vector.multi_reduction <add>, %139, %cst_68 [2] : vector<1x8x8xf32> to vector<1x8xf32>
    %141 = vector.shape_cast %140 : vector<1x8xf32> to vector<1x8x1xf32>
    %142 = tpu.reciprocal %141 {approx = true} : vector<1x8x1xf32> -> vector<1x8x1xf32>
    %143 = vector.broadcast %142 : vector<1x8x1xf32> to vector<1x8x8xf32>
    %144 = arith.mulf %139, %143 : vector<1x8x8xf32>
    %145 = arith.truncf %144 : vector<1x8x8xf32> to vector<1x8x8xbf16>
    "tpu.trace_start"() <{level = 10 : i32, message = "bqk,bkd->bqd"}> : () -> ()
    %cst_69 = arith.constant dense<0.000000e+00> : vector<1x8x8xf32>
    %146 = tpu.matmul %145, %131, %cst_69 {dimension_numbers = #tpu.dot_dimension_numbers<[2], [1], [1], [2], [0, 0, 0, 1, 1, 2], [0], [0]>} : vector<1x8x8xbf16>, vector<1x8x8xbf16>, vector<1x8x8xf32> -> vector<1x8x8xf32>
    "tpu.trace_stop"() : () -> ()
    %147 = vector.shape_cast %146 : vector<1x8x8xf32> to vector<8x8xf32>
    %148 = arith.truncf %147 : vector<8x8xf32> to vector<8x8xbf16>
    %c2_70 = arith.constant 2 : index
    %c0_71 = arith.constant 0 : index
    %c0_72 = arith.constant 0 : index
    %149 = vector.load %arg7[%c2_70, %c0_71, %c0_72] : memref<4x8x32xbf16, #tpu.memory_space<vmem>>, vector<1x8x32xbf16>
    %150 = vector.shape_cast %149 : vector<1x8x32xbf16> to vector<8x32xbf16>
    %cst_73 = arith.constant dense<0.000000e+00> : vector<8x32xf32>
    %151 = tpu.matmul %148, %150, %cst_73 {dimension_numbers = #tpu.dot_dimension_numbers<[1], [0], [0], [1], [0, 0, 1, 1], [], []>} : vector<8x8xbf16>, vector<8x32xbf16>, vector<8x32xf32> -> vector<8x32xf32>
    %152 = arith.addf %107, %151 : vector<8x32xf32>
    %c3 = arith.constant 3 : index
    %c0_74 = arith.constant 0 : index
    %c0_75 = arith.constant 0 : index
    %153 = vector.load %arg4[%c3, %c0_74, %c0_75] : memref<4x32x8xbf16, #tpu.memory_space<vmem>>, vector<1x32x8xbf16>
    %154 = vector.shape_cast %153 : vector<1x32x8xbf16> to vector<32x8xbf16>
    %cst_76 = arith.constant dense<0.000000e+00> : vector<8x8xf32>
    %155 = tpu.matmul %4, %154, %cst_76 {dimension_numbers = #tpu.dot_dimension_numbers<[1], [0], [0], [1], [0, 0, 1, 1], [], []>} : vector<8x32xbf16>, vector<32x8xbf16>, vector<8x8xf32> -> vector<8x8xf32>
    %c3_77 = arith.constant 3 : index
    %c0_78 = arith.constant 0 : index
    %c0_79 = arith.constant 0 : index
    %156 = vector.load %arg5[%c3_77, %c0_78, %c0_79] : memref<4x32x8xbf16, #tpu.memory_space<vmem>>, vector<1x32x8xbf16>
    %157 = vector.shape_cast %156 : vector<1x32x8xbf16> to vector<32x8xbf16>
    %cst_80 = arith.constant dense<0.000000e+00> : vector<8x8xf32>
    %158 = tpu.matmul %5, %157, %cst_80 {dimension_numbers = #tpu.dot_dimension_numbers<[1], [0], [0], [1], [0, 0, 1, 1], [], []>} : vector<8x32xbf16>, vector<32x8xbf16>, vector<8x8xf32> -> vector<8x8xf32>
    %c3_81 = arith.constant 3 : index
    %c0_82 = arith.constant 0 : index
    %c0_83 = arith.constant 0 : index
    %159 = vector.load %arg6[%c3_81, %c0_82, %c0_83] : memref<4x32x8xbf16, #tpu.memory_space<vmem>>, vector<1x32x8xbf16>
    %160 = vector.shape_cast %159 : vector<1x32x8xbf16> to vector<32x8xbf16>
    %cst_84 = arith.constant dense<0.000000e+00> : vector<8x8xf32>
    %161 = tpu.matmul %5, %160, %cst_84 {dimension_numbers = #tpu.dot_dimension_numbers<[1], [0], [0], [1], [0, 0, 1, 1], [], []>} : vector<8x32xbf16>, vector<32x8xbf16>, vector<8x8xf32> -> vector<8x8xf32>
    %162 = vector.extract_strided_slice %7 {offsets = [3, 0], sizes = [1, 8], strides = [1, 1]} : vector<12x8xf32> to vector<1x8xf32>
    %163 = vector.broadcast %162 : vector<1x8xf32> to vector<8x8xf32>
    %164 = arith.addf %155, %163 : vector<8x8xf32>
    %165 = vector.extract_strided_slice %7 {offsets = [7, 0], sizes = [1, 8], strides = [1, 1]} : vector<12x8xf32> to vector<1x8xf32>
    %166 = vector.broadcast %165 : vector<1x8xf32> to vector<8x8xf32>
    %167 = arith.addf %158, %166 : vector<8x8xf32>
    %168 = vector.extract_strided_slice %7 {offsets = [11, 0], sizes = [1, 8], strides = [1, 1]} : vector<12x8xf32> to vector<1x8xf32>
    %169 = vector.broadcast %168 : vector<1x8xf32> to vector<8x8xf32>
    %170 = arith.addf %161, %169 : vector<8x8xf32>
    %171 = vector.shape_cast %164 : vector<8x8xf32> to vector<1x8x8xf32>
    %172 = arith.truncf %171 : vector<1x8x8xf32> to vector<1x8x8xbf16>
    %173 = vector.shape_cast %167 : vector<8x8xf32> to vector<1x8x8xf32>
    %174 = arith.truncf %173 : vector<1x8x8xf32> to vector<1x8x8xbf16>
    %175 = vector.shape_cast %170 : vector<8x8xf32> to vector<1x8x8xf32>
    %176 = arith.truncf %175 : vector<1x8x8xf32> to vector<1x8x8xbf16>
    "tpu.trace_start"() <{level = 10 : i32, message = "bqd,bkd->bqk"}> : () -> ()
    %cst_85 = arith.constant dense<0.000000e+00> : vector<1x8x8xf32>
    %177 = tpu.matmul %172, %174, %cst_85 {dimension_numbers = #tpu.dot_dimension_numbers<[2], [2], [1], [1], [0, 0, 0, 1, 1, 1], [0], [0]>} : vector<1x8x8xbf16>, vector<1x8x8xbf16>, vector<1x8x8xf32> -> vector<1x8x8xf32>
    %cst_86 = arith.constant -1.000000e+30 : f32
    "tpu.trace_stop"() : () -> ()
    %178 = vector.broadcast %cst_86 : f32 to vector<1x8x8xf32>
    %179 = arith.select %16, %177, %178 : vector<1x8x8xi1>, vector<1x8x8xf32>
    %cst_87 = arith.constant dense<0xFF800000> : vector<1x8xf32>
    %180 = vector.multi_reduction <maximumf>, %179, %cst_87 [2] : vector<1x8x8xf32> to vector<1x8xf32>
    %181 = vector.shape_cast %180 : vector<1x8xf32> to vector<1x8x1xf32>
    %182 = vector.broadcast %181 : vector<1x8x1xf32> to vector<1x8x8xf32>
    %183 = arith.subf %179, %182 : vector<1x8x8xf32>
    %184 = math.exp %183 : vector<1x8x8xf32>
    %cst_88 = arith.constant dense<0.000000e+00> : vector<1x8xf32>
    %185 = vector.multi_reduction <add>, %184, %cst_88 [2] : vector<1x8x8xf32> to vector<1x8xf32>
    %186 = vector.shape_cast %185 : vector<1x8xf32> to vector<1x8x1xf32>
    %187 = tpu.reciprocal %186 {approx = true} : vector<1x8x1xf32> -> vector<1x8x1xf32>
    %188 = vector.broadcast %187 : vector<1x8x1xf32> to vector<1x8x8xf32>
    %189 = arith.mulf %184, %188 : vector<1x8x8xf32>
    %190 = arith.truncf %189 : vector<1x8x8xf32> to vector<1x8x8xbf16>
    "tpu.trace_start"() <{level = 10 : i32, message = "bqk,bkd->bqd"}> : () -> ()
    %cst_89 = arith.constant dense<0.000000e+00> : vector<1x8x8xf32>
    %191 = tpu.matmul %190, %176, %cst_89 {dimension_numbers = #tpu.dot_dimension_numbers<[2], [1], [1], [2], [0, 0, 0, 1, 1, 2], [0], [0]>} : vector<1x8x8xbf16>, vector<1x8x8xbf16>, vector<1x8x8xf32> -> vector<1x8x8xf32>
    "tpu.trace_stop"() : () -> ()
    %192 = vector.shape_cast %191 : vector<1x8x8xf32> to vector<8x8xf32>
    %193 = arith.truncf %192 : vector<8x8xf32> to vector<8x8xbf16>
    %c3_90 = arith.constant 3 : index
    %c0_91 = arith.constant 0 : index
    %c0_92 = arith.constant 0 : index
    %194 = vector.load %arg7[%c3_90, %c0_91, %c0_92] : memref<4x8x32xbf16, #tpu.memory_space<vmem>>, vector<1x8x32xbf16>
    %195 = vector.shape_cast %194 : vector<1x8x32xbf16> to vector<8x32xbf16>
    %cst_93 = arith.constant dense<0.000000e+00> : vector<8x32xf32>
    %196 = tpu.matmul %193, %195, %cst_93 {dimension_numbers = #tpu.dot_dimension_numbers<[1], [0], [0], [1], [0, 0, 1, 1], [], []>} : vector<8x8xbf16>, vector<8x32xbf16>, vector<8x32xf32> -> vector<8x32xf32>
    %197 = arith.addf %152, %196 : vector<8x32xf32>
    %198 = vector.extract_strided_slice %6 {offsets = [0, 0], sizes = [1, 32], strides = [1, 1]} : vector<8x32xf32> to vector<1x32xf32>
    %199 = vector.broadcast %198 : vector<1x32xf32> to vector<8x32xf32>
    %200 = arith.addf %197, %199 : vector<8x32xf32>
    %201 = arith.addf %1, %200 : vector<8x32xf32>
    %202 = vector.extract_strided_slice %6 {offsets = [1, 0], sizes = [1, 32], strides = [1, 1]} : vector<8x32xf32> to vector<1x32xf32>
    %203 = vector.extract_strided_slice %6 {offsets = [2, 0], sizes = [1, 32], strides = [1, 1]} : vector<8x32xf32> to vector<1x32xf32>
    %cst_94 = arith.constant dense<0.000000e+00> : vector<8xf32>
    %204 = vector.multi_reduction <add>, %201, %cst_94 [1] : vector<8x32xf32> to vector<8xf32>
    %205 = vector.shape_cast %204 : vector<8xf32> to vector<8x1xf32>
    %cst_95 = arith.constant 3.200000e+01 : f32
    %206 = vector.broadcast %cst_95 : f32 to vector<8x1xf32>
    %207 = arith.divf %205, %206 : vector<8x1xf32>
    %208 = vector.broadcast %207 : vector<8x1xf32> to vector<8x32xf32>
    %209 = arith.subf %201, %208 : vector<8x32xf32>
    %210 = arith.mulf %209, %209 : vector<8x32xf32>
    %cst_96 = arith.constant dense<0.000000e+00> : vector<8xf32>
    %211 = vector.multi_reduction <add>, %210, %cst_96 [1] : vector<8x32xf32> to vector<8xf32>
    %212 = vector.shape_cast %211 : vector<8xf32> to vector<8x1xf32>
    %cst_97 = arith.constant 3.200000e+01 : f32
    %213 = vector.broadcast %cst_97 : f32 to vector<8x1xf32>
    %214 = arith.divf %212, %213 : vector<8x1xf32>
    %215 = vector.broadcast %207 : vector<8x1xf32> to vector<8x32xf32>
    %216 = arith.subf %201, %215 : vector<8x32xf32>
    %cst_98 = arith.constant 9.99999974E-6 : f32
    %217 = vector.broadcast %cst_98 : f32 to vector<8x1xf32>
    %218 = arith.addf %214, %217 : vector<8x1xf32>
    %219 = math.rsqrt %218 : vector<8x1xf32>
    %220 = vector.broadcast %219 : vector<8x1xf32> to vector<8x32xf32>
    %221 = arith.mulf %216, %220 : vector<8x32xf32>
    %222 = vector.broadcast %202 : vector<1x32xf32> to vector<8x32xf32>
    %223 = arith.mulf %221, %222 : vector<8x32xf32>
    %224 = vector.broadcast %203 : vector<1x32xf32> to vector<8x32xf32>
    %225 = arith.addf %223, %224 : vector<8x32xf32>
    %226 = arith.truncf %225 : vector<8x32xf32> to vector<8x32xbf16>
    %c0_99 = arith.constant 0 : index
    %c0_100 = arith.constant 0 : index
    %227 = vector.load %arg8[%c0_99, %c0_100] : memref<32x32xbf16, #tpu.memory_space<vmem>>, vector<32x32xbf16>
    %cst_101 = arith.constant dense<0.000000e+00> : vector<8x32xf32>
    %228 = tpu.matmul %226, %227, %cst_101 {dimension_numbers = #tpu.dot_dimension_numbers<[1], [0], [0], [1], [0, 0, 1, 1], [], []>} : vector<8x32xbf16>, vector<32x32xbf16>, vector<8x32xf32> -> vector<8x32xf32>
    %229 = vector.extract_strided_slice %6 {offsets = [3, 0], sizes = [1, 32], strides = [1, 1]} : vector<8x32xf32> to vector<1x32xf32>
    %230 = vector.broadcast %229 : vector<1x32xf32> to vector<8x32xf32>
    %231 = arith.addf %228, %230 : vector<8x32xf32>
    %cst_102 = arith.constant 0.000000e+00 : f32
    %232 = vector.broadcast %cst_102 : f32 to vector<8x32xf32>
    %233 = arith.maximumf %231, %232 : vector<8x32xf32>
    %234 = arith.truncf %233 : vector<8x32xf32> to vector<8x32xbf16>
    %c0_103 = arith.constant 0 : index
    %c0_104 = arith.constant 0 : index
    %235 = vector.load %arg9[%c0_103, %c0_104] : memref<32x32xbf16, #tpu.memory_space<vmem>>, vector<32x32xbf16>
    %cst_105 = arith.constant dense<0.000000e+00> : vector<8x32xf32>
    %236 = tpu.matmul %234, %235, %cst_105 {dimension_numbers = #tpu.dot_dimension_numbers<[1], [0], [0], [1], [0, 0, 1, 1], [], []>} : vector<8x32xbf16>, vector<32x32xbf16>, vector<8x32xf32> -> vector<8x32xf32>
    %237 = vector.extract_strided_slice %6 {offsets = [4, 0], sizes = [1, 32], strides = [1, 1]} : vector<8x32xf32> to vector<1x32xf32>
    %238 = vector.broadcast %237 : vector<1x32xf32> to vector<8x32xf32>
    %239 = arith.addf %236, %238 : vector<8x32xf32>
    %240 = arith.addf %225, %239 : vector<8x32xf32>
    %241 = vector.extract_strided_slice %6 {offsets = [5, 0], sizes = [1, 32], strides = [1, 1]} : vector<8x32xf32> to vector<1x32xf32>
    %242 = vector.extract_strided_slice %6 {offsets = [6, 0], sizes = [1, 32], strides = [1, 1]} : vector<8x32xf32> to vector<1x32xf32>
    %cst_106 = arith.constant dense<0.000000e+00> : vector<8xf32>
    %243 = vector.multi_reduction <add>, %240, %cst_106 [1] : vector<8x32xf32> to vector<8xf32>
    %244 = vector.shape_cast %243 : vector<8xf32> to vector<8x1xf32>
    %cst_107 = arith.constant 3.200000e+01 : f32
    %245 = vector.broadcast %cst_107 : f32 to vector<8x1xf32>
    %246 = arith.divf %244, %245 : vector<8x1xf32>
    %247 = vector.broadcast %246 : vector<8x1xf32> to vector<8x32xf32>
    %248 = arith.subf %240, %247 : vector<8x32xf32>
    %249 = arith.mulf %248, %248 : vector<8x32xf32>
    %cst_108 = arith.constant dense<0.000000e+00> : vector<8xf32>
    %250 = vector.multi_reduction <add>, %249, %cst_108 [1] : vector<8x32xf32> to vector<8xf32>
    %251 = vector.shape_cast %250 : vector<8xf32> to vector<8x1xf32>
    %cst_109 = arith.constant 3.200000e+01 : f32
    %252 = vector.broadcast %cst_109 : f32 to vector<8x1xf32>
    %253 = arith.divf %251, %252 : vector<8x1xf32>
    %254 = vector.broadcast %246 : vector<8x1xf32> to vector<8x32xf32>
    %255 = arith.subf %240, %254 : vector<8x32xf32>
    %cst_110 = arith.constant 9.99999974E-6 : f32
    %256 = vector.broadcast %cst_110 : f32 to vector<8x1xf32>
    %257 = arith.addf %253, %256 : vector<8x1xf32>
    %258 = math.rsqrt %257 : vector<8x1xf32>
    %259 = vector.broadcast %258 : vector<8x1xf32> to vector<8x32xf32>
    %260 = arith.mulf %255, %259 : vector<8x32xf32>
    %261 = vector.broadcast %241 : vector<1x32xf32> to vector<8x32xf32>
    %262 = arith.mulf %260, %261 : vector<8x32xf32>
    %263 = vector.broadcast %242 : vector<1x32xf32> to vector<8x32xf32>
    %264 = arith.addf %262, %263 : vector<8x32xf32>
    %265 = vector.shape_cast %264 : vector<8x32xf32> to vector<1x8x32xf32>
    %266 = vector.extract_strided_slice %6 {offsets = [7, 0], sizes = [1, 32], strides = [1, 1]} : vector<8x32xf32> to vector<1x32xf32>
    %267 = vector.shape_cast %266 : vector<1x32xf32> to vector<1x1x32xf32>
    %268 = vector.broadcast %267 : vector<1x1x32xf32> to vector<1x8x32xf32>
    %269 = arith.mulf %265, %268 : vector<1x8x32xf32>
    %cst_111 = arith.constant dense<0.000000e+00> : vector<1x8xf32>
    %270 = vector.multi_reduction <add>, %269, %cst_111 [2] : vector<1x8x32xf32> to vector<1x8xf32>
    %c0_112 = arith.constant 0 : index
    %271 = memref.load %arg12[%c0_112] : memref<1xf32, #tpu.memory_space<smem>>
    %272 = vector.broadcast %271 : f32 to vector<1x8xf32>
    %273 = arith.addf %270, %272 : vector<1x8xf32>
    %274 = arith.negf %273 : vector<1x8xf32>
    %275 = math.exp %274 : vector<1x8xf32>
    %cst_113 = arith.constant 1.000000e+00 : f32
    %276 = vector.broadcast %cst_113 : f32 to vector<1x8xf32>
    %277 = arith.addf %276, %275 : vector<1x8xf32>
    %278 = arith.divf %276, %277 : vector<1x8xf32>
    %279 = vector.shape_cast %278 : vector<1x8xf32> to vector<1x1x8xf32>
    %c0_114 = arith.constant 0 : index
    %c0_115 = arith.constant 0 : index
    %c0_116 = arith.constant 0 : index
    %280 = vector.load %arg13[%c0_114, %c0_115, %c0_116] : memref<1x1x8xf32, #tpu.memory_space<vmem>>, vector<1x1x8xf32>
    tpu.vector_store %arg13[%c0_114, %c0_115, %c0_116], %279 {strides = array<i32>} : memref<1x1x8xf32, #tpu.memory_space<vmem>>, vector<1x1x8xf32>,
    return
  }
  func.func @transform_0(%arg0: i32) -> (i32, i32, i32) {
    %c0_i32 = arith.constant 0 : i32
    %c0_i32_0 = arith.constant 0 : i32
    %c0_i32_1 = arith.constant 0 : i32
    return %arg0, %c0_i32, %c0_i32_0 : i32, i32, i32
  }
  func.func @transform_1(%arg0: i32) -> (i32, i32, i32) {
    %c0_i32 = arith.constant 0 : i32
    %c0_i32_0 = arith.constant 0 : i32
    %c0_i32_1 = arith.constant 0 : i32
    return %arg0, %c0_i32, %c0_i32_0 : i32, i32, i32
  }
  func.func @transform_2(%arg0: i32) -> (i32, i32, i32) {
    %c0_i32 = arith.constant 0 : i32
    %c0_i32_0 = arith.constant 0 : i32
    %c0_i32_1 = arith.constant 0 : i32
    return %arg0, %c0_i32, %c0_i32_0 : i32, i32, i32
  }
  func.func @transform_3(%arg0: i32) -> (i32, i32, i32) {
    %c0_i32 = arith.constant 0 : i32
    %c0_i32_0 = arith.constant 0 : i32
    %c0_i32_1 = arith.constant 0 : i32
    %c0_i32_2 = arith.constant 0 : i32
    return %c0_i32, %c0_i32_0, %c0_i32_1 : i32, i32, i32
  }
  func.func @transform_4(%arg0: i32) -> (i32, i32, i32) {
    %c0_i32 = arith.constant 0 : i32
    %c0_i32_0 = arith.constant 0 : i32
    %c0_i32_1 = arith.constant 0 : i32
    %c0_i32_2 = arith.constant 0 : i32
    return %c0_i32, %c0_i32_0, %c0_i32_1 : i32, i32, i32
  }
  func.func @transform_5(%arg0: i32) -> (i32, i32, i32) {
    %c0_i32 = arith.constant 0 : i32
    %c0_i32_0 = arith.constant 0 : i32
    %c0_i32_1 = arith.constant 0 : i32
    %c0_i32_2 = arith.constant 0 : i32
    return %c0_i32, %c0_i32_0, %c0_i32_1 : i32, i32, i32
  }
  func.func @transform_6(%arg0: i32) -> (i32, i32, i32) {
    %c0_i32 = arith.constant 0 : i32
    %c0_i32_0 = arith.constant 0 : i32
    %c0_i32_1 = arith.constant 0 : i32
    %c0_i32_2 = arith.constant 0 : i32
    return %c0_i32, %c0_i32_0, %c0_i32_1 : i32, i32, i32
  }
  func.func @transform_7(%arg0: i32) -> (i32, i32) {
    %c0_i32 = arith.constant 0 : i32
    %c0_i32_0 = arith.constant 0 : i32
    %c0_i32_1 = arith.constant 0 : i32
    return %c0_i32, %c0_i32_0 : i32, i32
  }
  func.func @transform_8(%arg0: i32) -> (i32, i32) {
    %c0_i32 = arith.constant 0 : i32
    %c0_i32_0 = arith.constant 0 : i32
    %c0_i32_1 = arith.constant 0 : i32
    return %c0_i32, %c0_i32_0 : i32, i32
  }
  func.func @transform_9(%arg0: i32) -> (i32, i32) {
    %c0_i32 = arith.constant 0 : i32
    %c0_i32_0 = arith.constant 0 : i32
    %c0_i32_1 = arith.constant 0 : i32
    return %c0_i32, %c0_i32_0 : i32, i32
  }
  func.func @transform_10(%arg0: i32) -> (i32, i32) {
    %c0_i32 = arith.constant 0 : i32
    %c0_i32_0 = arith.constant 0 : i32
    %c0_i32_1 = arith.constant 0 : i32
    return %c0_i32, %c0_i32_0 : i32, i32
  }
  func.func @transform_11(%arg0: i32) -> i32 {
    %c0_i32 = arith.constant 0 : i32
    %c0_i32_0 = arith.constant 0 : i32
    return %c0_i32 : i32
  }
  func.func @transform_12(%arg0: i32) -> (i32, i32, i32) {
    %c0_i32 = arith.constant 0 : i32
    %c0_i32_0 = arith.constant 0 : i32
    %c0_i32_1 = arith.constant 0 : i32
    return %arg0, %c0_i32, %c0_i32_0 : i32, i32, i32
  }
}

</mosaic_0001>

<bundles_post_ra>
// kernel: tpu_custom_call.1
= control target key start
LH: loop header
LB: loop body
LE: loop exit
PB: predicated region body
PF: predicated region fallthrough
CT: control target
= control target key end

     0   :  { %s3189_s0 = inlined_call_operand.vmem [shape: f32[2,8,32], index: 0, kind: input, shape index: {}]   ;;  %s3190_s1 = inlined_call_operand.vmem [shape: f32[2,8,32], index: 1, kind: input, shape index: {}]   ;;  %s3191_s2 = inlined_call_operand.vmem [shape: f32[2,1,8], index: 2, kind: input, shape index: {}]   ;;  %s3192_s3 = inlined_call_operand.vmem [shape: bf16[4,32,8], index: 3, kind: input, shape index: {}]   ;;  %s3193_s4 = inlined_call_operand.vmem [shape: bf16[4,32,8], index: 4, kind: input, shape index: {}]   ;;  %s3194_s5 = inlined_call_operand.vmem [shape: bf16[4,32,8], index: 5, kind: input, shape index: {}]   ;;  %s3195_s6 = inlined_call_operand.vmem [shape: bf16[4,8,32], index: 6, kind: input, shape index: {}]   ;;  %s3196_s7 = inlined_call_operand.vmem [shape: bf16[32,32], index: 7, kind: input, shape index: {}]   ;;  %s3197_s8 = inlined_call_operand.vmem [shape: bf16[32,32], index: 8, kind: input, shape index: {}]   ;;  %s3198_s9 = inlined_call_operand.vmem [shape: f32[12,8], index: 9, kind: input, shape index: {}]   ;;  %s3199_s10 = inlined_call_operand.vmem [shape: f32[8,32], index: 10, kind: input, shape index: {}]   ;;  %s3200_s11 = inlined_call_operand.<no memory space> [shape: f32[1], index: 11, kind: input, shape index: {}]   ;;  %s3201_s12 = inlined_call_operand.hbm [shape: f32[2,1,8], index: 12, kind: output, shape index: {}]  }
   0x1   :  { %3202 = sst [smem:[#allocation6_spill]] %s3189_s0 }
   0x2   :  { %17 = sst [smem:[#allocation2]] %s3200_s11 }
   0x3   :  { %18 = vsyncpa [#allocation4], 0 }
   0x4   :  { %20 = vsyncpa [#allocation4 + $0x1], 0  ;;  %s2709_s23 = smov 0   ;;  %s2711_s24 = smov 0  }
   0x5   :  { %s2713_s25 = smov 0   ;;  %s2715_s26 = smov 0  }
   0x6 LB: > { %s2730_s11 = sadd.s32 4294967295, %s2635_s26   ;;  %s2126_s27 = sadd.s32 4294967294, %s2635_s26   ;;  %s2635_s26 = sphi %s2715_s26, %s3211_s26   ;;  %s2631_s25 = sphi %s2713_s25, %s3210_s25   ;;  %s2627_s24 = sphi %s2711_s24, %s3209_s24   ;;  %s2623_s23 = sphi %s2709_s23, %s3208_s23  }
   0x7   : > { %s2734_s28 = sadd.s32 1, %s2635_s26   ;;  %s300_s29 = sadd.s32 1, %s2631_s25 }
   0x8   : > { %s297_s30 = ssub.s32 %s2635_s26, %s2734_s28  ;;  %p310_p0 = scmp.ne.s32.totalorder %s2631_s25, %s2627_s24 }
   0x9   : > { %p298_p1 = scmp.eq.s32.totalorder %s297_s30, 0  ;;  %p311_p2 = scmp.eq.s32.totalorder %s2730_s11, 1 }
   0xa   : > { %p316_p3 = scmp.ne.s32.totalorder %s2627_s24, %s2623_s23  ;;  %p317_p4 = scmp.eq.s32.totalorder %s2126_s27, 1 }
   0xb   : > { %s2745_s13 = scalar_select %p298_p1, %s2631_s25, %s300_s29  }
   0xc   : > { %p2747_p5 = por %p311_p2, %p310_p0  ;;  %p2751_p6 = por %p317_p4, %p316_p3 }
   0xd   : > { %p2129_p7 = scmp.ge.s32.totalorder %s2635_s26, 1  ;;  %p382_p8 = scmp.lt.s32.totalorder %s2635_s26, 3 }
   0xf   : > { %p383_p9 = pnand %p2129_p7, %p382_p8 }
  0x10   : > { %v2521_v0 = vld [vmem:[%s3193_s4] sm:$0xff] (!%p383_p9)   ;;  %v2637_v1 = vmov (!%p383_p9), 0.0   ;;  %v2522_v2 = vld [vmem:[%s3193_s4 + $0x8] sm:$0xff] (!%p383_p9)   ;;  %vm2638_vm0 = vmmov (!%p383_p9), 0   ;;  %p429_p10 = scmp.lt.s32.totalorder (!%p383_p9), %s2730_s11, 1  ;;  %s3205_s0 = sld [smem:[#allocation6_spill]] (!%p383_p9)  ;;  %v448_v9 = vlaneseq (!%p383_p9) }
  0x11   : > { %386 = sbr.rel (%p383_p9) target bundleno = 5170 (0x1432), region = 68  ;;  %2303 = vmatprep.subr.bf16.mxu1 (!%p383_p9), %v2637_v1  ;;  %2295 = vmatprep.subr.bf16.mxu0 (!%p383_p9), %v2637_v1  ;;  %v2523_v3 = vld [vmem:[%s3192_s3] sm:$0xff] (!%p383_p9)   ;;  %v2524_v4 = vld [vmem:[%s3192_s3 + $0x8] sm:$0xff] (!%p383_p9)   ;;  %vm490_vm1 = vcmask (!%p383_p9), 261120   ;;  %vm652_vm2 = vcmask (!%p383_p9), 64512   ;;  %v2639_v32 = vmov (!%p383_p9), 0  }
  0x12   : > { %2304 = vmatpush3.bf16.msra.mxu1 (!%p383_p9), %v2521_v0  ;;  %2307 = vmatprep.mubr.msk.bf16.mxu1 (!%p383_p9), %vm2638_vm0, %v2637_v1  ;;  %v2806_v10 = vshrl.u32 (!%p383_p9), %v448_v9, 7  ;;  %v2812_v12 = vld [vmem:[%s3198_s9] sm:$0xff] (!%p383_p9)  ;;  %v2526_v30 = vld [vmem:[%s3194_s5 + $0x8] sm:$0xff] (!%p383_p9)   ;;  %v2843_v34 = vand.u32 (!%p383_p9), 127, %v448_v9  ;;  %vm715_vm7 = vcmask (!%p383_p9), 1043456   ;;  %v2529_v57 = vld [vmem:[%s3192_s3 + $0x10] sm:$0xff] (!%p383_p9)  }
  0x13   : > { %2305 = vmatprep.subr.bf16.mxu1 (!%p383_p9), %v2637_v1  ;;  %2299 = vmatprep.mubr.msk.bf16.mxu0 (!%p383_p9), %vm2638_vm0, %v2637_v1  ;;  %v2525_v29 = vld [vmem:[%s3194_s5] sm:$0xff] (!%p383_p9)   ;;  %v2859_v49 = vld [vmem:[%s3198_s9 + $0x8] sm:$0xf] (!%p383_p9)  ;;  %v2530_v58 = vld [vmem:[%s3192_s3 + $0x18] sm:$0xff] (!%p383_p9)   ;;  %s427_s19 = sand.u32 (!%p383_p9), 1, %s2627_s24   ;;  %s2226_s20 = sshll.u32 (!%p383_p9), %s2730_s11, 4 }
  0x14   : > { %2296 = vmatpush3.bf16.msra.mxu0 (!%p383_p9), %v2523_v3  ;;  %v536_v11 = vsub.s32 (!%p383_p9), 4, %v2806_v10  ;;  %v2818_v14 = vsub.s32 (!%p383_p9), 0, %v2806_v10  ;;  %vm452_vm4 = vcmp.le.s32.totalorder (!%p383_p9), %v2843_v34, %v2806_v10  ;;  %v2527_v62 = vld [vmem:[%s3193_s4 + $0x10] sm:$0xff] (!%p383_p9)   ;;  %v2528_v0 = vld [vmem:[%s3193_s4 + $0x18] sm:$0xff] (!%p383_p9)   ;;  %vm2035_vm8 = vcmask (!%p383_p9), 57344   ;;  %s2038_s16 = scalar_lea.sflag (!%p383_p9), [#allocation4], %s427_s19 }
  0x15   : > { %2297 = vmatprep.subr.bf16.mxu0 (!%p383_p9), %v2637_v1 }
  0x16   : > { %2306 = vmatpush3.bf16.msra.mxu1 (!%p383_p9), %v2522_v2  ;;  %v537_v13 = vrot.slane (!%p383_p9), %v2812_v12, %v536_v11  ;;  %v477_v19 = vrot.slane (!%p383_p9), %v2812_v12, %v2818_v14  ;;  %v596_v51 = vrot.slane (!%p383_p9), %v2859_v49, %v2818_v14 }
  0x17   : > { %2319 = vmatprep.subr.bf16.mxu1 (!%p383_p9), %v2637_v1 }
  0x18   : > { %s2775_s22 = scalar_select %p429_p10, %s2730_s11, 1  ;;  %2298 = vmatpush3.bf16.msra.mxu0 %v2524_v4 }
  0x19   : > { %2311 = vmatprep.subr.bf16.mxu0 %v2637_v1  ;;  %s2640_s11 = smov [#allocation3]  }
  0x1a   : > { %s2130_s30 = sshll.u32 %s2775_s22, 3 }
  0x1b   : > { %s436_s18 = scalar_lea.vmem %s3190_s1, %s2130_s30  ;;  %s432_s21 = scalar_lea.vmem %s3205_s0, %s2130_s30 }
  0x1c   : > { %v442_v5 = vld [vmem:[%s436_s18] sm:$0xff]  ;;  %s2020_s18 = sld [smem:[#allocation2]]  ;;  %s3147_s30 = scalar_lea.hbm %s3201_s12, %s2226_s20 }
  0x1d   : > { %v2789_v6 = vld [vmem:[%s432_s21] sm:$0xff]  ;;  %v2791_v7 = vpack.c.bf16 %v442_v5, %v442_v5  ;;  %s439_s21 = scalar_lea.vmem %s3191_s2, %s2775_s22 }
  0x1e   : > { %v2795_v8 = vpack.c.bf16 %v2789_v6, %v2789_v6  ;;  %v453_v31 = vld [vmem:[%s439_s21] sm:$0x1]  ;;  %s428_s21 = scalar_lea.vmem [#allocation3], %s427_s19 }
  0x1f   : > { %2308 = vmatmul.mubr.msk.bf16.vlgmr.msra.gmra.mrb[0].mxu1 %vm490_vm1, %v2791_v7  ;;  %vm454_vm3 = vcmp.gt.f32.partialorder %v453_v31, 0.5  ;;  %v2532_v31 = vld [vmem:[%s3194_s5 + $0x18] sm:$0xff]   ;;  %s2050_s22 = sshll.u32 %s428_s21, 4  ;;  %s3149_s22 = int_to_ptr.vmem [resolvable:$true] %s2050_s22 }
  0x20   : > { %2300 = vmatmul.mubr.msk.bf16.vlgmr.msra.gmra.mrb[0].mxu0 %vm490_vm1, %v2795_v8  ;;  %2321 = vmatprep.mubr.msk.bf16.mxu1 %vm2638_vm0, %v2637_v1  ;;  %v455_v33 = vsel %vm454_vm3, 1, %v2639_v32  ;;  %s2573_s17 = scalar_lea.vmem %s3149_s22, 16 }
  0x21   : > { %2315 = vmatprep.mubr.msk.bf16.mxu0 %vm2638_vm0, %v2637_v1  ;;  %2312 = vmatpush3.bf16.msra.mxu0 %v2525_v29  ;;  %v459_v35 = vrot.slane %v455_v33, %v2818_v14  ;;  %p2574_p11 = scmp.ne.s32.totalorder %s3149_s22, %s2573_s17 }
  0x22   : > { %2313 = vmatprep.subr.bf16.mxu0 %v2637_v1 }
  0x23   : > { %vm460_vm5 = vcmp.eq.s32.totalorder %v459_v35, 1  ;;  %p2575_p12 = pnand %p2574_p11, %p2747_p5 }
  0x24   : > { %vm2848_vm6 = vmand %vm452_vm4, %vm460_vm5 }
  0x25   : > { %2314 = vmatpush3.bf16.msra.mxu0 %v2526_v30  ;;  %v2531_v30 = vld [vmem:[%s3194_s5 + $0x10] sm:$0xff]   ;;  %p2576_p13 = pneg %p2575_p12 }
  0x26   : > { %2325 = vmatprep.subr.bf16.mxu0 %v2637_v1 }
  0x28   : > { %2316 = vmatmul.mubr.msk.bf16.vlgmr.msra.gmra.mrb[4].mxu0 %vm490_vm1, %v2791_v7 }
  0x29   : > { %2327 = vmatprep.mubr.msk.bf16.mxu0 %vm2638_vm0, %v2637_v1 }
  0xf2   : > { %v587_v15 = vpop.f32.mrb[0].mxu1 }
  0xf3   : > { %v528_v16 = vpop.f32.mrb[0].mxu0  ;;  %v588_v17 = vadd.f32 %v587_v15, %v537_v13  ;;  %v2309_v18 = vpop.f32.mrb[1].mxu1  ;;  %v834_v15 = vsub.s32 5, %v2806_v10 }
  0xf4   : > { %v2301_v20 = vpop.f32.mrb[1].mxu0  ;;  %v590_v21 = vpop.f32.mrb[2].mxu1  ;;  %v529_v27 = vadd.f32 %v528_v16, %v477_v19  ;;  %v2899_v19 = vsub.s32 1, %v2806_v10 }
  0xf5   : > { %v531_v22 = vpop.f32.mrb[2].mxu0  ;;  %v650_v23 = vpack.c.bf16 %v588_v17, %v588_v17  ;;  %v2310_v24 = vpop.f32.mrb[3].mxu1  ;;  %v835_v18 = vrot.slane %v2812_v12, %v834_v15 }
  0xf6   : > { %v2302_v25 = vpop.f32.mrb[3].mxu0  ;;  %v649_v28 = vpack.c.bf16 %v529_v27, %v529_v27 }
  0xf7   : > { %v657_v26 = vsel %vm652_vm2, %v650_v23, 0  ;;  %v779_v23 = vrot.slane %v2812_v12, %v2899_v19 }
  0xf8   : > { %2320 = vmatpush3.bf16.xpose.msra.mxu1 %v657_v26 }
  0xf9   : > { %2331 = vmatprep.subr.bf16.mxu1 %v2637_v1 }
  0xfb   : > { %v643_v48 = vpop.f32.mrb[4].mxu0 }
  0xfc   : > { %v2317_v50 = vpop.f32.mrb[5].mxu0  ;;  %v644_v54 = vadd.f32 %v643_v48, %v596_v51 }
  0xfd   : > { %v646_v52 = vpop.f32.mrb[6].mxu0 }
  0xfe   : > { %v2318_v53 = vpop.f32.mrb[7].mxu0  ;;  %v651_v55 = vpack.c.bf16 %v644_v54, %v644_v54  ;;  %v2166_v54 = vld [vmem:[%s3195_s6 + $0x4] sm:$0xf] }
  0xff   : > { %2322 = vmatmul.mubr.msk.bf16.vlgmr.msra.gmra.mrb[4].mxu1 %vm652_vm2, %v649_v28 }
 0x100   : > { %2335 = vmatprep.mubr.msk.bf16.mxu1 %vm2638_vm0, %v2637_v1  ;;  %v717_v56 = vsel %vm715_vm7, %v651_v55, 0  ;;  %2332 = vmatpush3.bf16.msra.mxu1 %v2529_v57  ;;  %v1059_v55 = vsel %vm715_vm7, %v2166_v54, 0 }
 0x101   : > { %2326 = vmatpush3.bf16.msra.mxu0 %v717_v56  ;;  %2333 = vmatprep.subr.bf16.mxu1 %v2637_v1 }
 0x102   : > { %2339 = vmatprep.subr.bf16.mxu0 %v2637_v1 }
 0x104   : > { %2334 = vmatpush3.bf16.msra.mxu1 %v2530_v58  ;;  %v760_v58 = vld [vmem:[%s3195_s6] sm:$0xf] }
 0x105   : > { %2347 = vmatprep.subr.bf16.mxu1 %v2637_v1 }
 0x107   : > { %2336 = vmatmul.mubr.msk.bf16.vlgmr.msra.gmra.mrb[8].mxu1 %vm490_vm1, %v2795_v8 }
 0x108   : > { %2351 = vmatprep.mubr.msk.bf16.mxu1 %vm2638_vm0, %v2637_v1  ;;  %2348 = vmatpush3.bf16.msra.mxu1 %v2531_v30 }
 0x109   : > { %2349 = vmatprep.subr.bf16.mxu1 %v2637_v1 }
 0x10c   : > { %2350 = vmatpush3.bf16.msra.mxu1 %v2532_v31 }
 0x10d   : > { %2361 = vmatprep.subr.bf16.mxu1 %v2637_v1 }
 0x10f   : > { %2352 = vmatmul.mubr.msk.bf16.vlgmr.msra.gmra.mrb[12].mxu1 %vm490_vm1, %v2791_v7 }
 0x110   : > { %2363 = vmatprep.mubr.msk.bf16.mxu1 %vm2638_vm0, %v2637_v1 }
 0x1d2   : > { %v693_v37 = vpop.f32.mrb[4].mxu1 }
 0x1d3   : > { %v699_v38 = vsel %vm2848_vm6, %v693_v37, -1e+30  ;;  %v2323_v39 = vpop.f32.mrb[5].mxu1 }
 0x1d4   : > { %v696_v40 = vpop.f32.mrb[6].mxu1  ;;  %v700_v41 = vsel %vm652_vm2, %v699_v38, -inf }
 0x1d5   : > { %701 = vmax.xlane.f32.xlu0 %v700_v41  ;;  %v2324_v42 = vpop.f32.mrb[7].mxu1  ;;  %v891_v40 = vrot.slane %v2859_v49, %v2899_v19 }
 0x1da   : > { %v826_v2 = vpop.f32.mrb[8].mxu1 }
 0x1db   : > { %v2337_v3 = vpop.f32.mrb[9].mxu1  ;;  %v827_v28 = vadd.f32 %v826_v2, %v779_v23 }
 0x1dc   : > { %v829_v4 = vpop.f32.mrb[10].mxu1  ;;  %v2535_v3 = vld [vmem:[%s3192_s3 + $0x20] sm:$0xff]  }
 0x1dd   : > { %v2338_v5 = vpop.f32.mrb[11].mxu1  ;;  %v944_v29 = vpack.c.bf16 %v827_v28, %v827_v28 }
 0x1e2   : > { %v938_v41 = vpop.f32.mrb[12].mxu1 }
 0x1e3   : > { %v939_v42 = vadd.f32 %v938_v41, %v891_v40 }
 0x262   : > { %v702_v43 = vpop.xlane.xlu0 %701 }
 0x263   : > { %v703_v44 = vsub.f32 %v699_v38, %v702_v43  ;;  %v2353_v43 = vpop.f32.mrb[13].mxu1 }
 0x265   : > { %v704_v45 = vmul.f32 1.442695, %v703_v44  ;;  %v941_v44 = vpop.f32.mrb[14].mxu1 }
 0x267   : > { %2549 = vpow2.f32 %v704_v45  ;;  %v946_v45 = vpack.c.bf16 %v939_v42, %v939_v42 }
 0x271   : > { %v2550_v46 = vpop.eup %2549 }
 0x272   : > { %v706_v47 = vsel %vm652_vm2, %v2550_v46, 0.0 }
 0x273   : > { %707 = vadd.xlane.f32.xlu0 %v706_v47  ;;  %v1010_v47 = vsel %vm715_vm7, %v946_v45, 0 }
 0x274   : > { %2362 = vmatpush3.bf16.msra.mxu1 %v1010_v47  ;;  %v2538_v47 = vld [vmem:[%s3194_s5 + $0x28] sm:$0xff]  }
 0x275   : > { %2373 = vmatprep.subr.bf16.mxu1 %v2637_v1 }
 0x300   : > { %v708_v59 = vpop.xlane.xlu0 %707 }
 0x301   : > { %2551 = vrcp.f32 %v708_v59 }
 0x30b   : > { %v2552_v60 = vpop.eup %2551 }
 0x30c   : > { %v710_v61 = vmul.f32 %v2552_v60, %v2550_v46  ;;  %v2354_v46 = vpop.f32.mrb[15].mxu1 }
 0x30d   : > { %v2537_v46 = vld [vmem:[%s3194_s5 + $0x20] sm:$0xff]  }
 0x30e   : > { %v711_v63 = vpack.c.bf16 %v710_v61, %v710_v61  ;;  %v1105_v61 = vsel %vm715_vm7, %v760_v58, 0 }
 0x310   : > { %2328 = vmatmul.mubr.msk.bf16.vlgmr.msra.gmra.mrb[8].mxu0 %vm652_vm2, %v711_v63 }
 0x311   : > { %2340 = vmatpush3.bf16.msra.mxu0 %v2527_v62  ;;  %2343 = vmatprep.mubr.msk.bf16.mxu0 %vm2638_vm0, %v2637_v1  ;;  %v2533_v62 = vld [vmem:[%s3193_s4 + $0x20] sm:$0xff]  }
 0x312   : > { %2341 = vmatprep.subr.bf16.mxu0 %v2637_v1 }
 0x315   : > { %2342 = vmatpush3.bf16.msra.mxu0 %v2528_v0  ;;  %v2534_v0 = vld [vmem:[%s3193_s4 + $0x28] sm:$0xff]  }
 0x316   : > { %2355 = vmatprep.subr.bf16.mxu0 %v2637_v1 }
 0x318   : > { %2344 = vmatmul.mubr.msk.bf16.vlgmr.msra.gmra.mrb[12].mxu0 %vm490_vm1, %v2791_v7 }
 0x319   : > { %2357 = vmatprep.mubr.msk.bf16.mxu0 %vm2638_vm0, %v2637_v1 }
 0x3e3   : > { %v2892_v9 = vpop.f32.mrb[8].mxu0 }
 0x3e4   : > { %v2329_v13 = vpop.f32.mrb[9].mxu0  ;;  %v759_v63 = vpack.c.bf16 %v2892_v9, %v2892_v9 }
 0x3e5   : > { %v756_v16 = vpop.f32.mrb[10].mxu0 }
 0x3e6   : > { %v2330_v17 = vpop.f32.mrb[11].mxu0  ;;  %v2536_v16 = vld [vmem:[%s3192_s3 + $0x28] sm:$0xff]  }
 0x3eb   : > { %v882_v20 = vpop.f32.mrb[12].mxu0 }
 0x3ec   : > { %v883_v21 = vadd.f32 %v882_v20, %v835_v18  ;;  %v2345_v22 = vpop.f32.mrb[13].mxu0  ;;  %v1220_v20 = vsub.s32 6, %v2806_v10 }
 0x3ed   : > { %v885_v24 = vpop.f32.mrb[14].mxu0 }
 0x3ee   : > { %v945_v25 = vpack.c.bf16 %v883_v21, %v883_v21  ;;  %v2346_v26 = vpop.f32.mrb[15].mxu0  ;;  %v1221_v23 = vrot.slane %v2812_v12, %v1220_v20 }
 0x3f0   : > { %v951_v27 = vsel %vm652_vm2, %v945_v25, 0 }
 0x3f1   : > { %2356 = vmatpush3.bf16.xpose.msra.mxu0 %v951_v27 }
 0x3f2   : > { %2367 = vmatprep.subr.bf16.mxu0 %v2637_v1 }
 0x3f8   : > { %2358 = vmatmul.mubr.msk.bf16.vlgmr.msra.gmra.mrb[16].mxu0 %vm652_vm2, %v944_v29 }
 0x3f9   : > { %2369 = vmatprep.mubr.msk.bf16.mxu0 %vm2638_vm0, %v2637_v1  ;;  %2368 = vmatpush3.bf16.msra.mxu0 %v1059_v55 }
 0x3fa   : > { %2379 = vmatprep.subr.bf16.mxu0 %v2637_v1 }
 0x4cb   : > { %v987_v32 = vpop.f32.mrb[16].mxu0 }
 0x4cc   : > { %v993_v33 = vsel %vm2848_vm6, %v987_v32, -1e+30  ;;  %v2359_v35 = vpop.f32.mrb[17].mxu0 }
 0x4cd   : > { %v990_v37 = vpop.f32.mrb[18].mxu0  ;;  %v994_v38 = vsel %vm652_vm2, %v993_v33, -inf  ;;  %v2982_v35 = vsub.s32 2, %v2806_v10 }
 0x4ce   : > { %995 = vmax.xlane.f32.xlu1 %v994_v38  ;;  %v2360_v39 = vpop.f32.mrb[19].mxu0 }
 0x4cf   : > { %v1165_v39 = vrot.slane %v2812_v12, %v2982_v35 }
 0x55b   : > { %v996_v48 = vpop.xlane.xlu1 %995 }
 0x55c   : > { %v997_v50 = vsub.f32 %v993_v33, %v996_v48 }
 0x55e   : > { %v998_v51 = vmul.f32 1.442695, %v997_v50 }
 0x560   : > { %2553 = vpow2.f32 %v998_v51 }
 0x56a   : > { %v2554_v52 = vpop.eup %2553 }
 0x56b   : > { %v1000_v53 = vsel %vm652_vm2, %v2554_v52, 0.0 }
 0x56c   : > { %1001 = vadd.xlane.f32.xlu1 %v1000_v53 }
 0x5f9   : > { %v1002_v56 = vpop.xlane.xlu1 %1001 }
 0x5fa   : > { %2555 = vrcp.f32 %v1002_v56 }
 0x604   : > { %v2556_v57 = vpop.eup %2555 }
 0x605   : > { %v1004_v59 = vmul.f32 %v2556_v57, %v2554_v52 }
 0x607   : > { %v1005_v60 = vpack.c.bf16 %v1004_v59, %v1004_v59 }
 0x609   : > { %2364 = vmatmul.mubr.msk.bf16.vlgmr.msra.gmra.mrb[16].mxu1 %vm652_vm2, %v1005_v60 }
 0x60a   : > { %2374 = vmatpush3.bf16.msra.mxu1 %v1105_v61  ;;  %2375 = vmatprep.mubr.msk.bf16.mxu1 %vm2638_vm0, %v2637_v1 }
 0x60b   : > { %2387 = vmatprep.subr.bf16.mxu1 %v2637_v1 }
 0x611   : > { %2376 = vmatmul.mubr.msk.bf16.vlgmr.msra.gmra.mrb[20].mxu1 %vm652_vm2, %v759_v63 }
 0x612   : > { %2388 = vmatpush3.bf16.msra.mxu1 %v2533_v62  ;;  %2391 = vmatprep.mubr.msk.bf16.mxu1 %vm2638_vm0, %v2637_v1  ;;  %v1277_v62 = vrot.slane %v2859_v49, %v2982_v35 }
 0x613   : > { %2389 = vmatprep.subr.bf16.mxu1 %v2637_v1 }
 0x616   : > { %2390 = vmatpush3.bf16.msra.mxu1 %v2534_v0 }
 0x617   : > { %2403 = vmatprep.subr.bf16.mxu1 %v2637_v1 }
 0x619   : > { %2392 = vmatmul.mubr.msk.bf16.vlgmr.msra.gmra.mrb[24].mxu1 %vm490_vm1, %v2791_v7 }
 0x61a   : > { %2405 = vmatprep.mubr.msk.bf16.mxu1 %vm2638_vm0, %v2637_v1 }
 0x6dc   : > { %v1046_v2 = vpop.f32.mrb[16].mxu1 }
 0x6dd   : > { %v1052_v4 = vpack.c.bf16 %v1046_v2, %v1046_v2  ;;  %v2365_v5 = vpop.f32.mrb[17].mxu1 }
 0x6de   : > { %v1049_v9 = vpop.f32.mrb[18].mxu1  ;;  %v2192_v5 = vld [vmem:[%s3195_s6 + $0x8] sm:$0xf] }
 0x6df   : > { %v2366_v13 = vpop.f32.mrb[19].mxu1  ;;  %2370 = vmatmul.mubr.msk.bf16.vlgmr.msra.gmra.mrb[20].mxu0 %vm652_vm2, %v1052_v4  ;;  %v1445_v9 = vsel %vm715_vm7, %v2192_v5, 0 }
 0x6e0   : > { %2380 = vmatpush3.bf16.msra.mxu0 %v2535_v3  ;;  %2383 = vmatprep.mubr.msk.bf16.mxu0 %vm2638_vm0, %v2637_v1 }
 0x6e1   : > { %2381 = vmatprep.subr.bf16.mxu0 %v2637_v1 }
 0x6e4   : > { %v1141_v17 = vpop.f32.mrb[20].mxu1  ;;  %2382 = vmatpush3.bf16.msra.mxu0 %v2536_v16 }
 0x6e5   : > { %v2377_v18 = vpop.f32.mrb[21].mxu1  ;;  %2395 = vmatprep.subr.bf16.mxu0 %v2637_v1 }
 0x6e6   : > { %v1144_v21 = vpop.f32.mrb[22].mxu1 }
 0x6e7   : > { %v2378_v22 = vpop.f32.mrb[23].mxu1  ;;  %2384 = vmatmul.mubr.msk.bf16.vlgmr.msra.gmra.mrb[24].mxu0 %vm490_vm1, %v2795_v8  ;;  %v2541_v21 = vld [vmem:[%s3192_s3 + $0x30] sm:$0xff]  }
 0x6e8   : > { %2399 = vmatprep.mubr.msk.bf16.mxu0 %vm2638_vm0, %v2637_v1  ;;  %2396 = vmatpush3.bf16.msra.mxu0 %v2537_v46  ;;  %v2542_v22 = vld [vmem:[%s3192_s3 + $0x38] sm:$0xff]  }
 0x6e9   : > { %2397 = vmatprep.subr.bf16.mxu0 %v2637_v1 }
 0x6ec   : > { %v1268_v24 = vpop.f32.mrb[24].mxu1  ;;  %2398 = vmatpush3.bf16.msra.mxu0 %v2538_v47 }
 0x6ed   : > { %v1269_v25 = vadd.f32 %v1268_v24, %v1221_v23  ;;  %v2393_v26 = vpop.f32.mrb[25].mxu1  ;;  %2409 = vmatprep.subr.bf16.mxu0 %v2637_v1  ;;  %v2539_v24 = vld [vmem:[%s3193_s4 + $0x30] sm:$0xff]  }
 0x6ee   : > { %v1271_v27 = vpop.f32.mrb[26].mxu1 }
 0x6ef   : > { %v1331_v28 = vpack.c.bf16 %v1269_v25, %v1269_v25  ;;  %v2394_v29 = vpop.f32.mrb[27].mxu1  ;;  %2400 = vmatmul.mubr.msk.bf16.vlgmr.msra.gmra.mrb[28].mxu0 %vm490_vm1, %v2791_v7 }
 0x6f0   : > { %2411 = vmatprep.mubr.msk.bf16.mxu0 %vm2638_vm0, %v2637_v1  ;;  %v2540_v29 = vld [vmem:[%s3193_s4 + $0x38] sm:$0xff]  }
 0x6f1   : > { %v1337_v30 = vsel %vm652_vm2, %v1331_v28, 0 }
 0x6f2   : > { %2404 = vmatpush3.bf16.xpose.msra.mxu1 %v1337_v30 }
 0x6f3   : > { %2415 = vmatprep.subr.bf16.mxu1 %v2637_v1 }
 0x7b2   : > { %v1095_v31 = vpop.f32.mrb[20].mxu0 }
 0x7b3   : > { %v2979_v32 = vadd.f32 %v1141_v17, %v1095_v31  ;;  %v2371_v33 = vpop.f32.mrb[21].mxu0 }
 0x7b4   : > { %v1098_v37 = vpop.f32.mrb[22].mxu0 }
 0x7b5   : > { %v2372_v38 = vpop.f32.mrb[23].mxu0 }
 0x7ba   : > { %v1212_v40 = vpop.f32.mrb[24].mxu0 }
 0x7bb   : > { %v1213_v41 = vadd.f32 %v1212_v40, %v1165_v39  ;;  %v2385_v42 = vpop.f32.mrb[25].mxu0  ;;  %v1561_v40 = vsub.s32 7, %v2806_v10 }
 0x7bc   : > { %v1215_v43 = vpop.f32.mrb[26].mxu0 }
 0x7bd   : > { %v1330_v44 = vpack.c.bf16 %v1213_v41, %v1213_v41  ;;  %v2386_v45 = vpop.f32.mrb[27].mxu0  ;;  %v1562_v43 = vrot.slane %v2812_v12, %v1561_v40 }
 0x7bf   : > { %2406 = vmatmul.mubr.msk.bf16.vlgmr.msra.gmra.mrb[28].mxu1 %vm652_vm2, %v1330_v44  ;;  %v3052_v44 = vsub.s32 3, %v2806_v10 }
 0x7c0   : > { %2417 = vmatprep.mubr.msk.bf16.mxu1 %vm2638_vm0, %v2637_v1  ;;  %2416 = vmatpush3.bf16.msra.mxu1 %v1445_v9 }
 0x7c1   : > { %2429 = vmatprep.subr.bf16.mxu1 %v2637_v1  ;;  %v1618_v36 = vrot.slane %v2859_v49, %v3052_v44 }
 0x7c2   : > { %v1324_v60 = vpop.f32.mrb[28].mxu0 }
 0x7c3   : > { %v2401_v61 = vpop.f32.mrb[29].mxu0  ;;  %v1325_v2 = vadd.f32 %v1324_v60, %v1277_v62 }
 0x7c4   : > { %v1327_v63 = vpop.f32.mrb[30].mxu0 }
 0x7c5   : > { %v2402_v0 = vpop.f32.mrb[31].mxu0  ;;  %v1332_v3 = vpack.c.bf16 %v1325_v2, %v1325_v2 }
 0x7c7   : > { %v1396_v4 = vsel %vm715_vm7, %v1332_v3, 0 }
 0x7c8   : > { %2410 = vmatpush3.bf16.msra.mxu0 %v1396_v4 }
 0x7c9   : > { %2421 = vmatprep.subr.bf16.mxu0 %v2637_v1 }
 0x892   : > { %v1373_v48 = vpop.f32.mrb[28].mxu1 }
 0x893   : > { %v1379_v50 = vsel %vm2848_vm6, %v1373_v48, -1e+30  ;;  %v2407_v51 = vpop.f32.mrb[29].mxu1  ;;  %v1506_v48 = vrot.slane %v2812_v12, %v3052_v44  ;;  %v2544_v12 = vld [vmem:[%s3194_s5 + $0x38] sm:$0xff]  }
 0x894   : > { %v1376_v52 = vpop.f32.mrb[30].mxu1  ;;  %v1380_v53 = vsel %vm652_vm2, %v1379_v50, -inf }
 0x895   : > { %1381 = vmax.xlane.f32.xlu0 %v1380_v53  ;;  %v2408_v54 = vpop.f32.mrb[31].mxu1 }
 0x922   : > { %v1382_v55 = vpop.xlane.xlu0 %1381 }
 0x923   : > { %v1383_v56 = vsub.f32 %v1379_v50, %v1382_v55  ;;  %v2543_v55 = vld [vmem:[%s3194_s5 + $0x30] sm:$0xff]  }
 0x925   : > { %v1384_v57 = vmul.f32 1.442695, %v1383_v56 }
 0x927   : > { %2557 = vpow2.f32 %v1384_v57 }
 0x931   : > { %v2558_v58 = vpop.eup %2557 }
 0x932   : > { %v1386_v59 = vsel %vm652_vm2, %v2558_v58, 0.0 }
 0x933   : > { %1387 = vadd.xlane.f32.xlu1 %v1386_v59 }
 0x9c0   : > { %v1388_v13 = vpop.xlane.xlu1 %1387 }
 0x9c1   : > { %2559 = vrcp.f32 %v1388_v13 }
 0x9cb   : > { %v2560_v16 = vpop.eup %2559 }
 0x9cc   : > { %v1390_v17 = vmul.f32 %v2560_v16, %v2558_v58 }
 0x9ce   : > { %v1391_v18 = vpack.c.bf16 %v1390_v17, %v1390_v17 }
 0x9d0   : > { %2412 = vmatmul.mubr.msk.bf16.vlgmr.msra.gmra.mrb[32].mxu0 %vm652_vm2, %v1391_v18  ;;  %v2217_v18 = vld [vmem:[%s3195_s6 + $0xc] sm:$0xf] }
 0x9d1   : > { %2425 = vmatprep.mubr.msk.bf16.mxu0 %vm2638_vm0, %v2637_v1  ;;  %2422 = vmatpush3.bf16.msra.mxu0 %v2541_v21  ;;  %v1786_v21 = vsel %vm715_vm7, %v2217_v18, 0 }
 0x9d2   : > { %2423 = vmatprep.subr.bf16.mxu0 %v2637_v1 }
 0x9d5   : > { %2424 = vmatpush3.bf16.msra.mxu0 %v2542_v22 }
 0x9d6   : > { %2437 = vmatprep.subr.bf16.mxu0 %v2637_v1 }
 0x9d8   : > { %2426 = vmatmul.mubr.msk.bf16.vlgmr.msra.gmra.mrb[36].mxu0 %vm490_vm1, %v2795_v8 }
 0x9d9   : > { %2441 = vmatprep.mubr.msk.bf16.mxu0 %vm2638_vm0, %v2637_v1  ;;  %2438 = vmatpush3.bf16.msra.mxu0 %v2543_v55 }
 0x9da   : > { %2439 = vmatprep.subr.bf16.mxu0 %v2637_v1 }
 0x9dd   : > { %2440 = vmatpush3.bf16.msra.mxu0 %v2544_v12 }
 0x9de   : > { %2451 = vmatprep.subr.bf16.mxu0 %v2637_v1 }
 0x9e0   : > { %2442 = vmatmul.mubr.msk.bf16.vlgmr.msra.gmra.mrb[40].mxu0 %vm490_vm1, %v2791_v7 }
 0x9e1   : > { %2453 = vmatprep.mubr.msk.bf16.mxu0 %vm2638_vm0, %v2637_v1 }
 0xaa3   : > { %v1432_v23 = vpop.f32.mrb[32].mxu0 }
 0xaa4   : > { %v1438_v25 = vpack.c.bf16 %v1432_v23, %v1432_v23  ;;  %v2413_v26 = vpop.f32.mrb[33].mxu0 }
 0xaa5   : > { %v1435_v27 = vpop.f32.mrb[34].mxu0 }
 0xaa6   : > { %v2414_v28 = vpop.f32.mrb[35].mxu0  ;;  %2418 = vmatmul.mubr.msk.bf16.vlgmr.msra.gmra.mrb[32].mxu1 %vm652_vm2, %v1438_v25 }
 0xaa7   : > { %2430 = vmatpush3.bf16.msra.mxu1 %v2539_v24  ;;  %2433 = vmatprep.mubr.msk.bf16.mxu1 %vm2638_vm0, %v2637_v1 }
 0xaa8   : > { %2431 = vmatprep.subr.bf16.mxu1 %v2637_v1 }
 0xaab   : > { %2432 = vmatpush3.bf16.msra.mxu1 %v2540_v29  ;;  %v1553_v8 = vpop.f32.mrb[36].mxu0 }
 0xaac   : > { %2445 = vmatprep.subr.bf16.mxu1 %v2637_v1  ;;  %v2427_v30 = vpop.f32.mrb[37].mxu0  ;;  %v1554_v53 = vadd.f32 %v1553_v8, %v1506_v48  ;;  %v3095_v8 = vld [vmem:[%s3199_s10] sm:$0xff] }
 0xaad   : > { %v1556_v31 = vpop.f32.mrb[38].mxu0  ;;  %v1832_v30 = vrot.slane %v3095_v8, %v2818_v14  ;;  %v2545_v14 = vld [vmem:[%s3196_s7] sm:$0xff]   ;;  %v1857_v55 = vrot.slane %v3095_v8, %v2982_v35  ;;  %v1867_v35 = vrot.slane %v3095_v8, %v3052_v44 }
 0xaae   : > { %2434 = vmatmul.mubr.msk.bf16.vlgmr.msra.gmra.mrb[36].mxu1 %vm490_vm1, %v2791_v7  ;;  %v2428_v33 = vpop.f32.mrb[39].mxu0  ;;  %v1671_v54 = vpack.c.bf16 %v1554_v53, %v1554_v53  ;;  %v1852_v53 = vrot.slane %v3095_v8, %v2899_v19  ;;  %v2548_v19 = vld [vmem:[%s3197_s8 + $0x8] sm:$0xff]  }
 0xaaf   : > { %2447 = vmatprep.mubr.msk.bf16.mxu1 %vm2638_vm0, %v2637_v1 }
 0xab3   : > { %v1665_v3 = vpop.f32.mrb[40].mxu0 }
 0xab4   : > { %v2443_v4 = vpop.f32.mrb[41].mxu0  ;;  %v1666_v13 = vadd.f32 %v1665_v3, %v1618_v36 }
 0xab5   : > { %v1668_v5 = vpop.f32.mrb[42].mxu0 }
 0xab6   : > { %v2444_v9 = vpop.f32.mrb[43].mxu0  ;;  %v1673_v16 = vpack.c.bf16 %v1666_v13, %v1666_v13 }
 0xab8   : > { %v1737_v17 = vsel %vm715_vm7, %v1673_v16, 0 }
 0xab9   : > { %2452 = vmatpush3.bf16.msra.mxu0 %v1737_v17 }
 0xaba   : > { %2463 = vmatprep.subr.bf16.mxu0 %v2637_v1 }
 0xb79   : > { %v1481_v37 = vpop.f32.mrb[32].mxu1 }
 0xb7a   : > { %v3045_v38 = vadd.f32 %v1481_v37, %v2979_v32  ;;  %v2419_v39 = vpop.f32.mrb[33].mxu1 }
 0xb7b   : > { %v1484_v41 = vpop.f32.mrb[34].mxu1 }
 0xb7c   : > { %v2420_v42 = vpop.f32.mrb[35].mxu1 }
 0xb81   : > { %v1609_v45 = vpop.f32.mrb[36].mxu1 }
 0xb82   : > { %v1610_v46 = vadd.f32 %v1609_v45, %v1562_v43  ;;  %v2435_v47 = vpop.f32.mrb[37].mxu1 }
 0xb83   : > { %v1612_v32 = vpop.f32.mrb[38].mxu1 }
 0xb84   : > { %v1672_v50 = vpack.c.bf16 %v1610_v46, %v1610_v46  ;;  %v2436_v51 = vpop.f32.mrb[39].mxu1 }
 0xb86   : > { %v1678_v52 = vsel %vm652_vm2, %v1672_v50, 0 }
 0xb87   : > { %2446 = vmatpush3.bf16.xpose.msra.mxu1 %v1678_v52 }
 0xb88   : > { %2457 = vmatprep.subr.bf16.mxu1 %v2637_v1 }
 0xb8e   : > { %2448 = vmatmul.mubr.msk.bf16.vlgmr.msra.gmra.mrb[40].mxu1 %vm652_vm2, %v1671_v54 }
 0xb8f   : > { %2459 = vmatprep.mubr.msk.bf16.mxu1 %vm2638_vm0, %v2637_v1  ;;  %2458 = vmatpush3.bf16.msra.mxu1 %v1786_v21 }
 0xb90   : > { %2471 = vmatprep.subr.bf16.mxu1 %v2637_v1 }
 0xc61   : > { %v1714_v56 = vpop.f32.mrb[40].mxu1 }
 0xc62   : > { %v1720_v57 = vsel %vm2848_vm6, %v1714_v56, -1e+30  ;;  %v2449_v58 = vpop.f32.mrb[41].mxu1 }
 0xc63   : > { %v1717_v59 = vpop.f32.mrb[42].mxu1  ;;  %v1721_v60 = vsel %vm652_vm2, %v1720_v57, -inf }
 0xc64   : > { %1722 = vmax.xlane.f32.xlu0 %v1721_v60  ;;  %v2450_v61 = vpop.f32.mrb[43].mxu1  ;;  %v2547_v59 = vld [vmem:[%s3197_s8] sm:$0xff]  }
 0xcf1   : > { %v1723_v62 = vpop.xlane.xlu0 %1722 }
 0xcf2   : > { %v1724_v63 = vsub.f32 %v1720_v57, %v1723_v62 }
 0xcf4   : > { %v1725_v0 = vmul.f32 1.442695, %v1724_v63 }
 0xcf6   : > { %2561 = vpow2.f32 %v1725_v0 }
 0xd00   : > { %v2562_v2 = vpop.eup %2561 }
 0xd01   : > { %v1727_v7 = vsel %vm652_vm2, %v2562_v2, 0.0 }
 0xd02   : > { %1728 = vadd.xlane.f32.xlu1 %v1727_v7 }
 0xd8f   : > { %v1729_v22 = vpop.xlane.xlu1 %1728 }
 0xd90   : > { %2563 = vrcp.f32 %v1729_v22 }
 0xd9a   : > { %v2564_v49 = vpop.eup %2563 }
 0xd9b   : > { %v1731_v23 = vmul.f32 %v2564_v49, %v2562_v2 }
 0xd9d   : > { %v1732_v24 = vpack.c.bf16 %v1731_v23, %v1731_v23 }
 0xd9f   : > { %2454 = vmatmul.mubr.msk.bf16.vlgmr.msra.gmra.mrb[44].mxu0 %vm652_vm2, %v1732_v24 }
 0xda0   : > { %2467 = vmatprep.mubr.msk.bf16.mxu0 %vm2638_vm0, %v2637_v1  ;;  %2464 = vmatpush3.bf16.msra.mxu0 %v2545_v14 }
 0xda1   : > { %2465 = vmatprep.subr.bf16.mxu0 %v2637_v1 }
 0xe72   : > { %v1773_v25 = vpop.f32.mrb[44].mxu0 }
 0xe73   : > { %v1779_v26 = vpack.c.bf16 %v1773_v25, %v1773_v25  ;;  %v2455_v27 = vpop.f32.mrb[45].mxu0 }
 0xe74   : > { %v1776_v28 = vpop.f32.mrb[46].mxu0  ;;  %v2010_v27 = vrot.slane %v3095_v8, %v1220_v20 }
 0xe75   : > { %v2456_v29 = vpop.f32.mrb[47].mxu0  ;;  %2460 = vmatmul.mubr.msk.bf16.vlgmr.msra.gmra.mrb[44].mxu1 %vm652_vm2, %v1779_v26 }
 0xe76   : > { %2475 = vmatprep.mubr.msk.bf16.mxu1 %vm2638_vm0, %v2637_v1  ;;  %2472 = vmatpush3.bf16.msra.mxu1 %v2547_v59  ;;  %v2015_v29 = vrot.slane %v3095_v8, %v1561_v40  ;;  %v2032_v40 = vsub.s32 %v2843_v34, %v2806_v10 }
 0xe77   : > { %2473 = vmatprep.subr.bf16.mxu1 %v2637_v1  ;;  %v1932_v1 = vrot.slane %v3095_v8, %v536_v11  ;;  %v2005_v11 = vrot.slane %v3095_v8, %v834_v15  ;;  %v2021_v15 = vstv %s2020_s18  ;;  %s2577_s18 = sshll.u32 %s2640_s11, 4  ;;  %s2578_s18 = int_to_ptr.vmem [resolvable:$false] %s2577_s18 }
 0xe78   : > { %s2579_s0 = scalar_lea.vmem %s2578_s18, 32  ;;  %p2580_p0 = scmp.lt.s32.totalorder %s3149_s22, %s2578_s18 }
 0xe79   : > { %p2581_p1 = scmp.lt.s32.totalorder %s2579_s0, %s2573_s17 }
 0xe7a   : > { %2474 = vmatpush3.bf16.msra.mxu1 %v2548_v19 }
 0xe7b   : > { %p2582_p2 = por %p2581_p1, %p2580_p0 }
 0xe7d   : > { %p2583_p3 = pnand %p2582_p2, %p2576_p13 }
 0xf48   : > { %v1822_v31 = vpop.f32.mrb[44].mxu1 }
 0xf49   : > { %v1828_v33 = vadd.f32 %v1822_v31, %v3045_v38  ;;  %v2461_v37 = vpop.f32.mrb[45].mxu1 }
 0xf4a   : > { %v1825_v39 = vpop.f32.mrb[46].mxu1 }
 0xf4b   : > { %v1833_v41 = vadd.f32 %v1832_v30, %v1828_v33  ;;  %v2462_v42 = vpop.f32.mrb[47].mxu1 }
 0xf4d   : > { %v1834_v43 = vadd.f32 %v1833_v41, %v2789_v6  ;;  %v2546_v6 = vld [vmem:[%s3196_s7 + $0x8] sm:$0xff]  }
 0xf4e   : > { %2466 = vmatpush3.bf16.msra.mxu0 %v2546_v6 }
 0xf4f   : > { %v1835_v45 = vsel %vm490_vm1, %v1834_v43, 0.0 }
 0xf50   : > { %1836 = vadd.xlane.f32.xlu0 %v1835_v45 }
 0xfdd   : > { %v1837_v46 = vpop.xlane.xlu0 %1836 }
 0xfde   : > { %v1839_v47 = vmul.f32 0.03125, %v1837_v46 }
 0xfe0   : > { %v1840_v48 = vsub.f32 %v1834_v43, %v1839_v47 }
 0xfe2   : > { %v1841_v32 = vmul.f32 %v1840_v48, %v1840_v48 }
 0xfe4   : > { %v1842_v50 = vsel %vm490_vm1, %v1841_v32, 0.0 }
 0xfe5   : > { %1843 = vadd.xlane.f32.xlu1 %v1842_v50 }
0x1072   : > { %v1844_v38 = vpop.xlane.xlu1 %1843 }
0x1073   : > { %v1845_v51 = vmul.f32 0.03125, %v1844_v38 }
0x1075   : > { %v1846_v52 = vadd.f32 1e-05, %v1845_v51 }
0x1077   : > { %2565 = vrsqrt.f32 %v1846_v52 }
0x1081   : > { %v2566_v54 = vpop.eup %2565 }
0x1082   : > { %v1848_v12 = vmul.f32 %v2566_v54, %v1840_v48 }
0x1084   : > { %v1853_v56 = vmul.f32 %v1852_v53, %v1848_v12 }
0x1086   : > { %v1858_v57 = vadd.f32 %v1857_v55, %v1853_v56 }
0x1088   : > { %v1859_v58 = vpack.c.bf16 %v1858_v57, %v1858_v57 }
0x108a   : > { %2468 = vmatmul.mubr.msk.bf16.vlgmr.msra.gmra.mrb[48].mxu0 %vm490_vm1, %v1859_v58 }
0x115d   : > { %v1917_v60 = vpop.f32.mrb[48].mxu0 }
0x115e   : > { %v1918_v61 = vadd.f32 %v1917_v60, %v1867_v35  ;;  %v2469_v62 = vpop.f32.mrb[49].mxu0 }
0x115f   : > { %v1920_v63 = vpop.f32.mrb[50].mxu0 }
0x1160   : > { %v1923_v0 = vmax.f32 %v1918_v61, 0.0  ;;  %v2470_v2 = vpop.f32.mrb[51].mxu0 }
0x1162   : > { %v1924_v7 = vpack.c.bf16 %v1923_v0, %v1923_v0 }
0x1164   : > { %2476 = vmatmul.mubr.msk.bf16.vlgmr.msra.gmra.mrb[48].mxu1 %vm490_vm1, %v1924_v7 }
0x1237   : > { %v1982_v3 = vpop.f32.mrb[48].mxu1 }
0x1238   : > { %v1983_v4 = vadd.f32 %v1982_v3, %v1932_v1  ;;  %v2477_v36 = vpop.f32.mrb[49].mxu1 }
0x1239   : > { %v1985_v5 = vpop.f32.mrb[50].mxu1 }
0x123a   : > { %v2478_v9 = vpop.f32.mrb[51].mxu1  ;;  %v1988_v13 = vadd.f32 %v1983_v4, %v1858_v57 }
0x123c   : > { %v1989_v44 = vsel %vm490_vm1, %v1988_v13, 0.0 }
0x123d   : > { %1990 = vadd.xlane.f32.xlu0 %v1989_v44 }
0x12ca   : > { %v1991_v16 = vpop.xlane.xlu0 %1990 }
0x12cb   : > { %v1992_v17 = vmul.f32 0.03125, %v1991_v16 }
0x12cd   : > { %v1993_v18 = vsub.f32 %v1988_v13, %v1992_v17 }
0x12cf   : > { %v1994_v21 = vmul.f32 %v1993_v18, %v1993_v18 }
0x12d1   : > { %v1995_v22 = vsel %vm490_vm1, %v1994_v21, 0.0 }
0x12d2   : > { %1996 = vadd.xlane.f32.xlu1 %v1995_v22 }
0x135f   : > { %v1997_v49 = vpop.xlane.xlu1 %1996 }
0x1360   : > { %v1998_v23 = vmul.f32 0.03125, %v1997_v49 }
0x1362   : > { %v1999_v24 = vadd.f32 1e-05, %v1998_v23 }
0x1364   : > { %2567 = vrsqrt.f32 %v1999_v24 }
0x136e   : > { %v2568_v25 = vpop.eup %2567 }
0x136f   : > { %v2001_v26 = vmul.f32 %v2568_v25, %v1993_v18 }
0x1371   : > { %v2006_v28 = vmul.f32 %v2005_v11, %v2001_v26 }
0x1373   : > { %v2011_v30 = vadd.f32 %v2010_v27, %v2006_v28 }
0x1375   : > { %v2016_v31 = vmul.f32 %v2015_v29, %v2011_v30 }
0x1377   : > { %v2017_v33 = vsel %vm490_vm1, %v2016_v31, 0.0 }
0x1378   : > { %2018 = vadd.xlane.f32.xlu0 %v2017_v33 }
0x1405   : > { %v2019_v37 = vpop.xlane.xlu0 %2018 }
0x1406   : > { %v2022_v39 = vadd.f32 %v2021_v15, %v2019_v37 }
0x1408   : > { %v2225_v41 = vmul.f32 -1.442695, %v2022_v39 }
0x140a   : > { %2569 = vpow2.f32 %v2225_v41 }
0x1414   : > { %v2570_v42 = vpop.eup %2569 }
0x1415   : > { %v2026_v20 = vadd.f32 1.0, %v2570_v42 }
0x1417   : > { %2571 = vrcp.f32 %v2026_v20 }
0x1421   : > { %v2572_v8 = vpop.eup %2571 }
0x1422   : > { %v2033_v43 = vrot.slane %v2572_v8, %v2032_v40 }
0x1424   : > { %2036 = vst.msk [vmem:[%s428_s21] sm:$0x1] %vm2035_vm8, %v2033_v43 }
0x1425   : > { %2586 = shalt.err (!%p2583_p3)
}
0x1426   : > { %s2587_s19 = scalar_lea.hbm %s3147_s30, 16  ;;  %s2591_s27 = scalar_lea.hbm %s3201_s12, 32 }
0x1427   : > { %p2588_p4 = scmp.ne.s32.totalorder %s3147_s30, %s2587_s19  ;;  %p2592_p9 = scmp.lt.u32.totalorder %s3147_s30, %s3201_s12 }
0x1428   : > { %p2593_p10 = scmp.lt.u32.totalorder %s2591_s27, %s2587_s19  ;;  %p2595_p12 = scmp.lt.u32.totalorder %s2587_s19, %s3147_s30 }
0x1429   : > { %p2589_p7 = pnand %p2588_p4, %p2747_p5 }
0x142a   : > { %p2594_p11 = por %p2593_p10, %p2592_p9 }
0x142b   : > { %p2590_p8 = pneg %p2589_p7 }
0x142c   : > { %p2596_p13 = por %p2595_p12, %p2594_p11 }
0x142e   : > { %p2597_p0 = pnand %p2596_p13, %p2590_p8 }
0x1430   : > { %2600 = shalt.err (!%p2597_p0)
}
0x1431   : > { %2479 = dma.vmem_to_hbm [thread:$0]  (%p2747_p5), %s3149_s22, 16, %s3147_s30, %s2038_s16  }
0x1432 PF: > { %p2485_p1 = scmp.ge.s32.totalorder %s2635_s26, 2  ;;  %s2062_s0 = sand.u32 1, %s2623_s23  }
0x1433   : > { %s2063_s17 = scalar_lea.sflag [#allocation4], %s2062_s0 }
0x1434   : > { %p2482_p2 = pnand %p2485_p1, %p2751_p6 }
0x1436   : > { %2618 = dma.done.wait (!%p2482_p2), %s2063_s17, 16  }
0x1437   : > { %2620 = vsyncadd (!%p2482_p2), %s2063_s17, 4294967280  ;;  %p23_p3 = scmp.ge.s32.totalorder %s2734_s28, 4   ;;  %s3208_s23 = smov %s2627_s24 }
0x1438   : > { %s3209_s24 = smov %s2631_s25  ;;  %s3210_s25 = smov %s2745_s13 }
0x1439   : > { %s3211_s26 = smov %s2734_s28  ;;  %25 = sbr.rel (!%p23_p3) target bundleno = 6 (0x6), region = 121 }
0x1440   :  { %2067 = vsyncpa [#allocation4], 1 }
0x1441   :  { %2069 = vsyncpa [#allocation4 + $0x1], 1 }

</bundles_post_ra>
